<compile_context>
chip_gen: v7x
topology: tpu7x:2x2x1
jax: 0.10.0
libtpu: 0.0.40
codegen_flags: <defaults>
</compile_context>

<pallas_src>
import functools
import math

import jax
import jax.numpy as jnp
from jax import lax
from jax.experimental import pallas as pl
from jax.experimental.pallas import tpu as pltpu

EPS = 1e-6
NEG_INF = -1e9


def _decoder_block_kernel(
    ln_ref,                                  # SMEM (6,): a1,b1,a2,b2,a3,b3
    x_ref, enc_ref, smask_ref,               # activations / padding mask
    wqkv1_ref, bqkv1_ref, wo1_ref, bo1_ref,  # self-attn (fused QKV)
    wq2_ref, bq2_ref, wkv2_ref, bkv2_ref, wo2_ref, bo2_ref,  # cross-attn
    w1_ref, b1_ref, w2_ref, b2_ref,          # FFN
    o_ref,
    *, num_heads,
):
    x = x_ref[0].astype(jnp.float32)              # (S, D)
    enc_bf = enc_ref[0].astype(jnp.bfloat16)      # (Se, D) — MXU operand only
    S, D = x.shape
    d_k = D // num_heads

    # --- attention biases, computed once (hoisted out of the head loops) ---
    # Causal target mask generated in-kernel: zero HBM traffic for S*S ints.
    rows = lax.broadcasted_iota(jnp.int32, (S, S), 0)
    cols = lax.broadcasted_iota(jnp.int32, (S, S), 1)
    causal_bias = jnp.where(rows >= cols, 0.0, NEG_INF)              # (S, S)
    # Cross-attention padding mask: per-key vector, broadcast over queries.
    src_bias = jnp.where(smask_ref[0].astype(jnp.float32) == 0.0,
                         NEG_INF, 0.0)                               # (1, Se)

    def layer_norm(h, alpha, bias):
        n = h.shape[-1]
        mean = jnp.mean(h, axis=-1, keepdims=True)
        c = h - mean
        # unbiased variance (ddof=1) to match torch.std() default
        var = jnp.sum(c * c, axis=-1, keepdims=True) * (1.0 / (n - 1))
        inv = pl.reciprocal(jnp.sqrt(var) + EPS, approx=False)
        return c * (alpha * inv) + bias

    def linear(h_bf, w_ref, b_ref):
        # bf16 operands, f32 accumulation on the MXU; f32 bias add.
        return (jnp.dot(h_bf, w_ref[...], preferred_element_type=jnp.float32)
                + b_ref[...])

    def attention(q, k, v, bias_add, wo_ref, bo_ref):
        # q: (Sq, D) f32 (1/sqrt(d_k) already folded into W_q); k,v: (Sk, D).
        qb = q.astype(jnp.bfloat16)
        kb = k.astype(jnp.bfloat16)
        vb = v.astype(jnp.bfloat16)
        heads = []
        for hh in range(num_heads):                # static per-head loop
            sl = slice(hh * d_k, (hh + 1) * d_k)
            s = lax.dot_general(qb[:, sl], kb[:, sl], (((1,), (1,)), ((), ())),
                                preferred_element_type=jnp.float32)
            s = s + bias_add                       # masked_fill as additive bias
            m = jnp.max(s, axis=-1, keepdims=True)
            e = jnp.exp(s - m)
            p = e * pl.reciprocal(jnp.sum(e, axis=-1, keepdims=True),
                                  approx=True)     # EUP slot
            heads.append(jnp.dot(p.astype(jnp.bfloat16), vb[:, sl],
                                 preferred_element_type=jnp.float32))
        # Single K=D output projection instead of per-head W_o folding.
        concat = jnp.concatenate(heads, axis=-1).astype(jnp.bfloat16)  # (Sq, D)
        return (jnp.dot(concat, wo_ref[...], preferred_element_type=jnp.float32)
                + bo_ref[...])

    a1, g1 = ln_ref[0], ln_ref[1]
    a2, g2 = ln_ref[2], ln_ref[3]
    a3, g3 = ln_ref[4], ln_ref[5]

    # 1) self-attention residual (pre-norm); fused QKV projection.
    xn = layer_norm(x, a1, g1)
    qkv = linear(xn.astype(jnp.bfloat16), wqkv1_ref, bqkv1_ref)      # (S, 3D)
    x = x + attention(qkv[:, :D], qkv[:, D:2 * D], qkv[:, 2 * D:],
                      causal_bias, wo1_ref, bo1_ref)

    # 2) cross-attention residual; fused KV projection of the encoder output.
    xn = layer_norm(x, a2, g2)
    q2 = linear(xn.astype(jnp.bfloat16), wq2_ref, bq2_ref)           # (S, D)
    kv = linear(enc_bf, wkv2_ref, bkv2_ref)                          # (Se, 2D)
    x = x + attention(q2, kv[:, :D], kv[:, D:], src_bias, wo2_ref, bo2_ref)

    # 3) feed-forward residual: linear -> relu -> linear
    xn = layer_norm(x, a3, g3)
    hdn = jnp.maximum(linear(xn.astype(jnp.bfloat16), w1_ref, b1_ref), 0.0)
    x = x + linear(hdn.astype(jnp.bfloat16), w2_ref, b2_ref)

    o_ref[0] = x.astype(o_ref.dtype)


def decoder_block(x, enc, src_key_mask, ln_params, weights, *, num_heads):
    """Fused pre-norm decoder block.

    x:            (B, S, D)   decoder activations
    enc:          (B, Se, D)  encoder output
    src_key_mask: (B, Se)     per-key padding mask (0 = masked)
    ln_params:    (6,)        [alpha1, bias1, alpha2, bias2, alpha3, bias3]
    weights:      20-tuple of raw (PyTorch-layout) 2-D weights/biases
    The causal target mask is generated inside the kernel.
    """
    (wq1, bq1, wk1, bk1, wv1, bv1, wo1, bo1,
     wq2, bq2, wk2, bk2, wv2, bv2, wo2, bo2,
     w1, b1, w2, b2) = weights

    B, S, D = x.shape
    Se = enc.shape[1]
    d_k = D // num_heads
    scale = 1.0 / math.sqrt(d_k)
    bf = jnp.bfloat16

    # Host-side weight prep (one-time): fold 1/sqrt(d_k) into W_q/b_q, fuse
    # QKV / KV projections, cast weights to bf16 (biases stay f32).
    wqkv1 = jnp.concatenate([wq1 * scale, wk1, wv1], axis=1).astype(bf)  # (D,3D)
    bqkv1 = jnp.concatenate([bq1 * scale, bk1, bv1], axis=1)             # (1,3D)
    wkv2 = jnp.concatenate([wk2, wv2], axis=1).astype(bf)                # (D,2D)
    bkv2 = jnp.concatenate([bk2, bv2], axis=1)                           # (1,2D)
    fused = (
        wqkv1, bqkv1, wo1.astype(bf), bo1,
        (wq2 * scale).astype(bf), bq2 * scale, wkv2, bkv2, wo2.astype(bf), bo2,
        w1.astype(bf), b1, w2.astype(bf), b2,
    )

    smask = src_key_mask.astype(jnp.int8).reshape(B, 1, Se)

    act_specs = [
        pl.BlockSpec((1, S, D), lambda b: (b, 0, 0)),    # x
        pl.BlockSpec((1, Se, D), lambda b: (b, 0, 0)),   # encoder output
        pl.BlockSpec((1, 1, Se), lambda b: (b, 0, 0)),   # per-key src mask
    ]
    # Weights are grid-invariant (constant index map): fetched once, resident
    # in VMEM across all batch steps.
    weight_specs = [pl.BlockSpec(w.shape, lambda b: (0, 0)) for w in fused]

    kernel = functools.partial(_decoder_block_kernel, num_heads=num_heads)
    return pl.pallas_call(
        kernel,
        out_shape=jax.ShapeDtypeStruct((B, S, D), x.dtype),
        grid=(B,),
        in_specs=[pl.BlockSpec(memory_space=pltpu.MemorySpace.SMEM)]
        + act_specs + weight_specs,
        out_specs=pl.BlockSpec((1, S, D), lambda b: (b, 0, 0)),
        compiler_params=pltpu.CompilerParams(
            dimension_semantics=("parallel",),
            vmem_limit_bytes=32 * 1024 * 1024,
        ),
    )(ln_params, x, enc, smask, *fused)


# --------------------------- pure-JAX reference ---------------------------
_PREC = jax.lax.Precision.HIGHEST


def _ref_decoder_block(x, enc, tgt_mask, src_mask, ln_params, weights, *,
                       num_heads):
    (wq1, bq1, wk1, bk1, wv1, bv1, wo1, bo1,
     wq2, bq2, wk2, bk2, wv2, bv2, wo2, bo2,
     w1, b1, w2, b2) = weights

    def mm(a, b):
        return jnp.matmul(a, b, precision=_PREC)

    def ln(h, alpha, bias):
        mean = jnp.mean(h, axis=-1, keepdims=True)
        std = jnp.sqrt(jnp.sum((h - mean) ** 2, axis=-1, keepdims=True)
                       / (h.shape[-1] - 1))
        return alpha * (h - mean) / (std + EPS) + bias

    def mha(q_in, kv_in, mask, wq, bq, wk, bk, wv, bv, wo, bo):
        B_, Sq, Dm = q_in.shape
        Sk = kv_in.shape[1]
        dk = Dm // num_heads
        q = (mm(q_in, wq) + bq).reshape(B_, Sq, num_heads, dk).transpose(0, 2, 1, 3)
        k = (mm(kv_in, wk) + bk).reshape(B_, Sk, num_heads, dk).transpose(0, 2, 1, 3)
        v = (mm(kv_in, wv) + bv).reshape(B_, Sk, num_heads, dk).transpose(0, 2, 1, 3)
        s = jnp.einsum("bhqd,bhkd->bhqk", q, k, precision=_PREC) / math.sqrt(dk)
        s = jnp.where(mask[:, None, :, :] == 0, NEG_INF, s)
        p = jax.nn.softmax(s, axis=-1)
        o = jnp.einsum("bhqk,bhkd->bhqd", p, v, precision=_PREC)
        o = o.transpose(0, 2, 1, 3).reshape(B_, Sq, Dm)
        return mm(o, wo) + bo

    a1, g1, a2, g2, a3, g3 = (ln_params[i] for i in range(6))
    h = x
    hn = ln(h, a1, g1)
    h = h + mha(hn, hn, tgt_mask, wq1, bq1, wk1, bk1, wv1, bv1, wo1, bo1)
    hn = ln(h, a2, g2)
    h = h + mha(hn, enc, src_mask, wq2, bq2, wk2, bk2, wv2, bv2, wo2, bo2)
    hn = ln(h, a3, g3)
    h = h + (mm(jnp.maximum(mm(hn, w1) + b1, 0.0), w2) + b2)
    return h


if __name__ == "__main__":
    B, S, Se, D, H, DFF = 2, 8, 8, 32, 4, 64

    key = jax.random.PRNGKey(0)
    keys = jax.random.split(key, 22)

    def init(k, shape, scale=0.1):
        return jax.random.normal(k, shape, jnp.float32) * scale

    x = jax.random.normal(keys[0], (B, S, D), jnp.float32)
    enc = jax.random.normal(keys[1], (B, Se, D), jnp.float32)

    weights = (
        init(keys[2], (D, D)), init(keys[3], (1, D)),        # self-attn w_q, b_q
        init(keys[4], (D, D)), init(keys[5], (1, D)),        # self-attn w_k, b_k
        init(keys[6], (D, D)), init(keys[7], (1, D)),        # self-attn w_v, b_v
        init(keys[8], (D, D)), init(keys[9], (1, D)),        # self-attn w_o, b_o
        init(keys[10], (D, D)), init(keys[11], (1, D)),      # cross-attn w_q, b_q
        init(keys[12], (D, D)), init(keys[13], (1, D)),      # cross-attn w_k, b_k
        init(keys[14], (D, D)), init(keys[15], (1, D)),      # cross-attn w_v, b_v
        init(keys[16], (D, D)), init(keys[17], (1, D)),      # cross-attn w_o, b_o
        init(keys[18], (D, DFF)), init(keys[19], (1, DFF)),  # FFN linear_1
        init(keys[20], (DFF, D)), init(keys[21], (1, D)),    # FFN linear_2
    )
    # LayerNormalization params: alpha=1, bias=0 (PyTorch init), three norms.
    ln_params = jnp.array([1.0, 0.0, 1.0, 0.0, 1.0, 0.0], jnp.float32)

    # Per-key padding mask for cross-attention (0 = masked); causal target
    # mask is generated inside the kernel.
    src_key_mask = jnp.ones((B, Se), jnp.int32).at[1, Se - 2:].set(0)

    out = decoder_block(x, enc, src_key_mask, ln_params, weights, num_heads=H)
    out = jax.block_until_ready(out)

    # Reference uses full explicit masks and f32 HIGHEST-precision matmuls.
    tgt_mask = jnp.broadcast_to(jnp.tril(jnp.ones((S, S), jnp.int32)), (B, S, S))
    src_mask = jnp.broadcast_to(src_key_mask[:, None, :], (B, S, Se))
    ref = _ref_decoder_block(x, enc, tgt_mask, src_mask, ln_params, weights,
                             num_heads=H)
    assert out.shape == ref.shape
    max_err = float(jnp.max(jnp.abs(out - ref)))
    # Kernel runs bf16 MXU operands with f32 accumulation vs. an all-f32
    # HIGHEST-precision reference -> keep a bf16-appropriate tolerance.
    assert jnp.allclose(out, ref, atol=2e-2, rtol=2e-2), \
        f"mismatch vs reference: max|err|={max_err}"

    print("KERNEL_OK")
</pallas_src>

<mosaic_0001>
module attributes {stable_mosaic.version = 11 : i64} {
  func.func @_decoder_block_kernel(%arg0: i32, %arg1: memref<6xf32, #tpu.memory_space<smem>>, %arg2: memref<1x8x32xf32, #tpu.memory_space<vmem>>, %arg3: memref<1x8x32xf32, #tpu.memory_space<vmem>>, %arg4: memref<1x1x8xi8, #tpu.memory_space<vmem>>, %arg5: memref<32x96xbf16, #tpu.memory_space<vmem>>, %arg6: memref<1x96xf32, #tpu.memory_space<vmem>>, %arg7: memref<32x32xbf16, #tpu.memory_space<vmem>>, %arg8: memref<1x32xf32, #tpu.memory_space<vmem>>, %arg9: memref<32x32xbf16, #tpu.memory_space<vmem>>, %arg10: memref<1x32xf32, #tpu.memory_space<vmem>>, %arg11: memref<32x64xbf16, #tpu.memory_space<vmem>>, %arg12: memref<1x64xf32, #tpu.memory_space<vmem>>, %arg13: memref<32x32xbf16, #tpu.memory_space<vmem>>, %arg14: memref<1x32xf32, #tpu.memory_space<vmem>>, %arg15: memref<32x64xbf16, #tpu.memory_space<vmem>>, %arg16: memref<1x64xf32, #tpu.memory_space<vmem>>, %arg17: memref<64x32xbf16, #tpu.memory_space<vmem>>, %arg18: memref<1x32xf32, #tpu.memory_space<vmem>>, %arg19: memref<1x8x32xf32, #tpu.memory_space<vmem>>) attributes {dimension_semantics = [#tpu.dimension_semantics<parallel>], iteration_bounds = array<i64: 2>, scalar_prefetch = 0 : i64, scratch_operands = 0 : i64, tpu.core_type = #tpu.core_type<tc>, window_params = [{transform_indices = @transform_0, window_bounds = array<i64: 6>}, {transform_indices = @transform_1, window_bounds = array<i64: 1, 8, 32>}, {transform_indices = @transform_2, window_bounds = array<i64: 1, 8, 32>}, {transform_indices = @transform_3, window_bounds = array<i64: 1, 1, 8>}, {pipeline_mode = #tpu.pipeline_mode<synchronous>, transform_indices = @transform_4, window_bounds = array<i64: 32, 96>}, {pipeline_mode = #tpu.pipeline_mode<synchronous>, transform_indices = @transform_5, window_bounds = array<i64: 1, 96>}, {pipeline_mode = #tpu.pipeline_mode<synchronous>, transform_indices = @transform_6, window_bounds = array<i64: 32, 32>}, {pipeline_mode = #tpu.pipeline_mode<synchronous>, transform_indices = @transform_7, window_bounds = array<i64: 1, 32>}, {pipeline_mode = #tpu.pipeline_mode<synchronous>, transform_indices = @transform_8, window_bounds = array<i64: 32, 32>}, {pipeline_mode = #tpu.pipeline_mode<synchronous>, transform_indices = @transform_9, window_bounds = array<i64: 1, 32>}, {pipeline_mode = #tpu.pipeline_mode<synchronous>, transform_indices = @transform_10, window_bounds = array<i64: 32, 64>}, {pipeline_mode = #tpu.pipeline_mode<synchronous>, transform_indices = @transform_11, window_bounds = array<i64: 1, 64>}, {pipeline_mode = #tpu.pipeline_mode<synchronous>, transform_indices = @transform_12, window_bounds = array<i64: 32, 32>}, {pipeline_mode = #tpu.pipeline_mode<synchronous>, transform_indices = @transform_13, window_bounds = array<i64: 1, 32>}, {pipeline_mode = #tpu.pipeline_mode<synchronous>, transform_indices = @transform_14, window_bounds = array<i64: 32, 64>}, {pipeline_mode = #tpu.pipeline_mode<synchronous>, transform_indices = @transform_15, window_bounds = array<i64: 1, 64>}, {pipeline_mode = #tpu.pipeline_mode<synchronous>, transform_indices = @transform_16, window_bounds = array<i64: 64, 32>}, {pipeline_mode = #tpu.pipeline_mode<synchronous>, transform_indices = @transform_17, window_bounds = array<i64: 1, 32>}, {transform_indices = @transform_18, window_bounds = array<i64: 1, 8, 32>}]} {
    %c0 = arith.constant 0 : index
    %c0_0 = arith.constant 0 : index
    %c0_1 = arith.constant 0 : index
    %0 = vector.load %arg2[%c0, %c0_0, %c0_1] : memref<1x8x32xf32, #tpu.memory_space<vmem>>, vector<1x8x32xf32>
    %1 = vector.shape_cast %0 : vector<1x8x32xf32> to vector<8x32xf32>
    %c0_2 = arith.constant 0 : index
    %c0_3 = arith.constant 0 : index
    %c0_4 = arith.constant 0 : index
    %2 = vector.load %arg3[%c0_2, %c0_3, %c0_4] : memref<1x8x32xf32, #tpu.memory_space<vmem>>, vector<1x8x32xf32>
    %3 = vector.shape_cast %2 : vector<1x8x32xf32> to vector<8x32xf32>
    %4 = arith.truncf %3 : vector<8x32xf32> to vector<8x32xbf16>
    %5 = tpu.iota {dimensions = array<i32: 0>} : vector<8x8xi32>
    %6 = tpu.iota {dimensions = array<i32: 1>} : vector<8x8xi32>
    %7 = arith.cmpi sge, %5, %6 : vector<8x8xi32>
    %cst = arith.constant 0.000000e+00 : f32
    %cst_5 = arith.constant -1.000000e+09 : f32
    %8 = vector.broadcast %cst : f32 to vector<8x8xf32>
    %9 = vector.broadcast %cst_5 : f32 to vector<8x8xf32>
    %10 = arith.select %7, %8, %9 : vector<8x8xi1>, vector<8x8xf32>
    %c0_6 = arith.constant 0 : index
    %c0_7 = arith.constant 0 : index
    %c0_8 = arith.constant 0 : index
    %11 = vector.load %arg4[%c0_6, %c0_7, %c0_8] : memref<1x1x8xi8, #tpu.memory_space<vmem>>, vector<1x1x8xi8>
    %12 = vector.shape_cast %11 : vector<1x1x8xi8> to vector<1x8xi8>
    %13 = arith.sitofp %12 : vector<1x8xi8> to vector<1x8xf32>
    %cst_9 = arith.constant 0.000000e+00 : f32
    %14 = vector.broadcast %cst_9 : f32 to vector<1x8xf32>
    %15 = arith.cmpf oeq, %13, %14 : vector<1x8xf32>
    %cst_10 = arith.constant -1.000000e+09 : f32
    %cst_11 = arith.constant 0.000000e+00 : f32
    %16 = vector.broadcast %cst_10 : f32 to vector<1x8xf32>
    %17 = vector.broadcast %cst_11 : f32 to vector<1x8xf32>
    %18 = arith.select %15, %16, %17 : vector<1x8xi1>, vector<1x8xf32>
    %c0_12 = arith.constant 0 : index
    %19 = memref.load %arg1[%c0_12] : memref<6xf32, #tpu.memory_space<smem>>
    %c1 = arith.constant 1 : index
    %20 = memref.load %arg1[%c1] : memref<6xf32, #tpu.memory_space<smem>>
    %c2 = arith.constant 2 : index
    %21 = memref.load %arg1[%c2] : memref<6xf32, #tpu.memory_space<smem>>
    %c3 = arith.constant 3 : index
    %22 = memref.load %arg1[%c3] : memref<6xf32, #tpu.memory_space<smem>>
    %c4 = arith.constant 4 : index
    %23 = memref.load %arg1[%c4] : memref<6xf32, #tpu.memory_space<smem>>
    %c5 = arith.constant 5 : index
    %24 = memref.load %arg1[%c5] : memref<6xf32, #tpu.memory_space<smem>>
    %cst_13 = arith.constant dense<0.000000e+00> : vector<8xf32>
    %25 = vector.multi_reduction <add>, %1, %cst_13 [1] : vector<8x32xf32> to vector<8xf32>
    %26 = vector.shape_cast %25 : vector<8xf32> to vector<8x1xf32>
    %cst_14 = arith.constant 3.200000e+01 : f32
    %27 = vector.broadcast %cst_14 : f32 to vector<8x1xf32>
    %28 = arith.divf %26, %27 : vector<8x1xf32>
    %29 = vector.broadcast %28 : vector<8x1xf32> to vector<8x32xf32>
    %30 = arith.subf %1, %29 : vector<8x32xf32>
    %31 = arith.mulf %30, %30 : vector<8x32xf32>
    %cst_15 = arith.constant dense<0.000000e+00> : vector<8xf32>
    %32 = vector.multi_reduction <add>, %31, %cst_15 [1] : vector<8x32xf32> to vector<8xf32>
    %33 = vector.shape_cast %32 : vector<8xf32> to vector<8x1xf32>
    %cst_16 = arith.constant 0.0322580636 : f32
    %34 = vector.broadcast %cst_16 : f32 to vector<8x1xf32>
    %35 = arith.mulf %33, %34 : vector<8x1xf32>
    %36 = math.sqrt %35 : vector<8x1xf32>
    %cst_17 = arith.constant 9.99999997E-7 : f32
    %37 = vector.broadcast %cst_17 : f32 to vector<8x1xf32>
    %38 = arith.addf %36, %37 : vector<8x1xf32>
    %39 = tpu.reciprocal %38 : vector<8x1xf32> -> vector<8x1xf32>
    %40 = vector.broadcast %19 : f32 to vector<8x1xf32>
    %41 = arith.mulf %40, %39 : vector<8x1xf32>
    %42 = vector.broadcast %41 : vector<8x1xf32> to vector<8x32xf32>
    %43 = arith.mulf %30, %42 : vector<8x32xf32>
    %44 = vector.broadcast %20 : f32 to vector<8x32xf32>
    %45 = arith.addf %43, %44 : vector<8x32xf32>
    %46 = arith.truncf %45 : vector<8x32xf32> to vector<8x32xbf16>
    %c0_18 = arith.constant 0 : index
    %c0_19 = arith.constant 0 : index
    %47 = vector.load %arg5[%c0_18, %c0_19] : memref<32x96xbf16, #tpu.memory_space<vmem>>, vector<32x96xbf16>
    %cst_20 = arith.constant dense<0.000000e+00> : vector<8x96xf32>
    %48 = tpu.matmul %46, %47, %cst_20 {dimension_numbers = #tpu.dot_dimension_numbers<[1], [0], [0], [1], [0, 0, 1, 1], [], []>} : vector<8x32xbf16>, vector<32x96xbf16>, vector<8x96xf32> -> vector<8x96xf32>
    %c0_21 = arith.constant 0 : index
    %c0_22 = arith.constant 0 : index
    %49 = vector.load %arg6[%c0_21, %c0_22] : memref<1x96xf32, #tpu.memory_space<vmem>>, vector<1x96xf32>
    %50 = vector.broadcast %49 : vector<1x96xf32> to vector<8x96xf32>
    %51 = arith.addf %48, %50 : vector<8x96xf32>
    %52 = vector.extract_strided_slice %51 {offsets = [0, 0], sizes = [8, 32], strides = [1, 1]} : vector<8x96xf32> to vector<8x32xf32>
    %53 = vector.extract_strided_slice %51 {offsets = [0, 32], sizes = [8, 32], strides = [1, 1]} : vector<8x96xf32> to vector<8x32xf32>
    %54 = vector.extract_strided_slice %51 {offsets = [0, 64], sizes = [8, 32], strides = [1, 1]} : vector<8x96xf32> to vector<8x32xf32>
    %55 = arith.truncf %52 : vector<8x32xf32> to vector<8x32xbf16>
    %56 = arith.truncf %53 : vector<8x32xf32> to vector<8x32xbf16>
    %57 = arith.truncf %54 : vector<8x32xf32> to vector<8x32xbf16>
    %58 = vector.extract_strided_slice %55 {offsets = [0, 0], sizes = [8, 8], strides = [1, 1]} : vector<8x32xbf16> to vector<8x8xbf16>
    %59 = vector.extract_strided_slice %56 {offsets = [0, 0], sizes = [8, 8], strides = [1, 1]} : vector<8x32xbf16> to vector<8x8xbf16>
    %cst_23 = arith.constant dense<0.000000e+00> : vector<8x8xf32>
    %60 = tpu.matmul %58, %59, %cst_23 {dimension_numbers = #tpu.dot_dimension_numbers<[1], [1], [0], [0], [0, 0, 1, 0], [], []>} : vector<8x8xbf16>, vector<8x8xbf16>, vector<8x8xf32> -> vector<8x8xf32>
    %61 = arith.addf %60, %10 : vector<8x8xf32>
    %cst_24 = arith.constant dense<0xFF800000> : vector<8xf32>
    %62 = vector.multi_reduction <maximumf>, %61, %cst_24 [1] : vector<8x8xf32> to vector<8xf32>
    %63 = vector.shape_cast %62 : vector<8xf32> to vector<8x1xf32>
    %64 = vector.broadcast %63 : vector<8x1xf32> to vector<8x8xf32>
    %65 = arith.subf %61, %64 : vector<8x8xf32>
    %66 = math.exp %65 : vector<8x8xf32>
    %cst_25 = arith.constant dense<0.000000e+00> : vector<8xf32>
    %67 = vector.multi_reduction <add>, %66, %cst_25 [1] : vector<8x8xf32> to vector<8xf32>
    %68 = vector.shape_cast %67 : vector<8xf32> to vector<8x1xf32>
    %69 = tpu.reciprocal %68 {approx = true} : vector<8x1xf32> -> vector<8x1xf32>
    %70 = vector.broadcast %69 : vector<8x1xf32> to vector<8x8xf32>
    %71 = arith.mulf %66, %70 : vector<8x8xf32>
    %72 = arith.truncf %71 : vector<8x8xf32> to vector<8x8xbf16>
    %73 = vector.extract_strided_slice %57 {offsets = [0, 0], sizes = [8, 8], strides = [1, 1]} : vector<8x32xbf16> to vector<8x8xbf16>
    %cst_26 = arith.constant dense<0.000000e+00> : vector<8x8xf32>
    %74 = tpu.matmul %72, %73, %cst_26 {dimension_numbers = #tpu.dot_dimension_numbers<[1], [0], [0], [1], [0, 0, 1, 1], [], []>} : vector<8x8xbf16>, vector<8x8xbf16>, vector<8x8xf32> -> vector<8x8xf32>
    %75 = vector.extract_strided_slice %55 {offsets = [0, 8], sizes = [8, 8], strides = [1, 1]} : vector<8x32xbf16> to vector<8x8xbf16>
    %76 = vector.extract_strided_slice %56 {offsets = [0, 8], sizes = [8, 8], strides = [1, 1]} : vector<8x32xbf16> to vector<8x8xbf16>
    %cst_27 = arith.constant dense<0.000000e+00> : vector<8x8xf32>
    %77 = tpu.matmul %75, %76, %cst_27 {dimension_numbers = #tpu.dot_dimension_numbers<[1], [1], [0], [0], [0, 0, 1, 0], [], []>} : vector<8x8xbf16>, vector<8x8xbf16>, vector<8x8xf32> -> vector<8x8xf32>
    %78 = arith.addf %77, %10 : vector<8x8xf32>
    %cst_28 = arith.constant dense<0xFF800000> : vector<8xf32>
    %79 = vector.multi_reduction <maximumf>, %78, %cst_28 [1] : vector<8x8xf32> to vector<8xf32>
    %80 = vector.shape_cast %79 : vector<8xf32> to vector<8x1xf32>
    %81 = vector.broadcast %80 : vector<8x1xf32> to vector<8x8xf32>
    %82 = arith.subf %78, %81 : vector<8x8xf32>
    %83 = math.exp %82 : vector<8x8xf32>
    %cst_29 = arith.constant dense<0.000000e+00> : vector<8xf32>
    %84 = vector.multi_reduction <add>, %83, %cst_29 [1] : vector<8x8xf32> to vector<8xf32>
    %85 = vector.shape_cast %84 : vector<8xf32> to vector<8x1xf32>
    %86 = tpu.reciprocal %85 {approx = true} : vector<8x1xf32> -> vector<8x1xf32>
    %87 = vector.broadcast %86 : vector<8x1xf32> to vector<8x8xf32>
    %88 = arith.mulf %83, %87 : vector<8x8xf32>
    %89 = arith.truncf %88 : vector<8x8xf32> to vector<8x8xbf16>
    %90 = vector.extract_strided_slice %57 {offsets = [0, 8], sizes = [8, 8], strides = [1, 1]} : vector<8x32xbf16> to vector<8x8xbf16>
    %cst_30 = arith.constant dense<0.000000e+00> : vector<8x8xf32>
    %91 = tpu.matmul %89, %90, %cst_30 {dimension_numbers = #tpu.dot_dimension_numbers<[1], [0], [0], [1], [0, 0, 1, 1], [], []>} : vector<8x8xbf16>, vector<8x8xbf16>, vector<8x8xf32> -> vector<8x8xf32>
    %92 = vector.extract_strided_slice %55 {offsets = [0, 16], sizes = [8, 8], strides = [1, 1]} : vector<8x32xbf16> to vector<8x8xbf16>
    %93 = vector.extract_strided_slice %56 {offsets = [0, 16], sizes = [8, 8], strides = [1, 1]} : vector<8x32xbf16> to vector<8x8xbf16>
    %cst_31 = arith.constant dense<0.000000e+00> : vector<8x8xf32>
    %94 = tpu.matmul %92, %93, %cst_31 {dimension_numbers = #tpu.dot_dimension_numbers<[1], [1], [0], [0], [0, 0, 1, 0], [], []>} : vector<8x8xbf16>, vector<8x8xbf16>, vector<8x8xf32> -> vector<8x8xf32>
    %95 = arith.addf %94, %10 : vector<8x8xf32>
    %cst_32 = arith.constant dense<0xFF800000> : vector<8xf32>
    %96 = vector.multi_reduction <maximumf>, %95, %cst_32 [1] : vector<8x8xf32> to vector<8xf32>
    %97 = vector.shape_cast %96 : vector<8xf32> to vector<8x1xf32>
    %98 = vector.broadcast %97 : vector<8x1xf32> to vector<8x8xf32>
    %99 = arith.subf %95, %98 : vector<8x8xf32>
    %100 = math.exp %99 : vector<8x8xf32>
    %cst_33 = arith.constant dense<0.000000e+00> : vector<8xf32>
    %101 = vector.multi_reduction <add>, %100, %cst_33 [1] : vector<8x8xf32> to vector<8xf32>
    %102 = vector.shape_cast %101 : vector<8xf32> to vector<8x1xf32>
    %103 = tpu.reciprocal %102 {approx = true} : vector<8x1xf32> -> vector<8x1xf32>
    %104 = vector.broadcast %103 : vector<8x1xf32> to vector<8x8xf32>
    %105 = arith.mulf %100, %104 : vector<8x8xf32>
    %106 = arith.truncf %105 : vector<8x8xf32> to vector<8x8xbf16>
    %107 = vector.extract_strided_slice %57 {offsets = [0, 16], sizes = [8, 8], strides = [1, 1]} : vector<8x32xbf16> to vector<8x8xbf16>
    %cst_34 = arith.constant dense<0.000000e+00> : vector<8x8xf32>
    %108 = tpu.matmul %106, %107, %cst_34 {dimension_numbers = #tpu.dot_dimension_numbers<[1], [0], [0], [1], [0, 0, 1, 1], [], []>} : vector<8x8xbf16>, vector<8x8xbf16>, vector<8x8xf32> -> vector<8x8xf32>
    %109 = vector.extract_strided_slice %55 {offsets = [0, 24], sizes = [8, 8], strides = [1, 1]} : vector<8x32xbf16> to vector<8x8xbf16>
    %110 = vector.extract_strided_slice %56 {offsets = [0, 24], sizes = [8, 8], strides = [1, 1]} : vector<8x32xbf16> to vector<8x8xbf16>
    %cst_35 = arith.constant dense<0.000000e+00> : vector<8x8xf32>
    %111 = tpu.matmul %109, %110, %cst_35 {dimension_numbers = #tpu.dot_dimension_numbers<[1], [1], [0], [0], [0, 0, 1, 0], [], []>} : vector<8x8xbf16>, vector<8x8xbf16>, vector<8x8xf32> -> vector<8x8xf32>
    %112 = arith.addf %111, %10 : vector<8x8xf32>
    %cst_36 = arith.constant dense<0xFF800000> : vector<8xf32>
    %113 = vector.multi_reduction <maximumf>, %112, %cst_36 [1] : vector<8x8xf32> to vector<8xf32>
    %114 = vector.shape_cast %113 : vector<8xf32> to vector<8x1xf32>
    %115 = vector.broadcast %114 : vector<8x1xf32> to vector<8x8xf32>
    %116 = arith.subf %112, %115 : vector<8x8xf32>
    %117 = math.exp %116 : vector<8x8xf32>
    %cst_37 = arith.constant dense<0.000000e+00> : vector<8xf32>
    %118 = vector.multi_reduction <add>, %117, %cst_37 [1] : vector<8x8xf32> to vector<8xf32>
    %119 = vector.shape_cast %118 : vector<8xf32> to vector<8x1xf32>
    %120 = tpu.reciprocal %119 {approx = true} : vector<8x1xf32> -> vector<8x1xf32>
    %121 = vector.broadcast %120 : vector<8x1xf32> to vector<8x8xf32>
    %122 = arith.mulf %117, %121 : vector<8x8xf32>
    %123 = arith.truncf %122 : vector<8x8xf32> to vector<8x8xbf16>
    %124 = vector.extract_strided_slice %57 {offsets = [0, 24], sizes = [8, 8], strides = [1, 1]} : vector<8x32xbf16> to vector<8x8xbf16>
    %cst_38 = arith.constant dense<0.000000e+00> : vector<8x8xf32>
    %125 = tpu.matmul %123, %124, %cst_38 {dimension_numbers = #tpu.dot_dimension_numbers<[1], [0], [0], [1], [0, 0, 1, 1], [], []>} : vector<8x8xbf16>, vector<8x8xbf16>, vector<8x8xf32> -> vector<8x8xf32>
    %126 = tpu.concatenate %74, %91, %108, %125 in 1 : vector<8x8xf32>, vector<8x8xf32>, vector<8x8xf32>, vector<8x8xf32> -> vector<8x32xf32>
    %127 = arith.truncf %126 : vector<8x32xf32> to vector<8x32xbf16>
    %c0_39 = arith.constant 0 : index
    %c0_40 = arith.constant 0 : index
    %128 = vector.load %arg7[%c0_39, %c0_40] : memref<32x32xbf16, #tpu.memory_space<vmem>>, vector<32x32xbf16>
    %cst_41 = arith.constant dense<0.000000e+00> : vector<8x32xf32>
    %129 = tpu.matmul %127, %128, %cst_41 {dimension_numbers = #tpu.dot_dimension_numbers<[1], [0], [0], [1], [0, 0, 1, 1], [], []>} : vector<8x32xbf16>, vector<32x32xbf16>, vector<8x32xf32> -> vector<8x32xf32>
    %c0_42 = arith.constant 0 : index
    %c0_43 = arith.constant 0 : index
    %130 = vector.load %arg8[%c0_42, %c0_43] : memref<1x32xf32, #tpu.memory_space<vmem>>, vector<1x32xf32>
    %131 = vector.broadcast %130 : vector<1x32xf32> to vector<8x32xf32>
    %132 = arith.addf %129, %131 : vector<8x32xf32>
    %133 = arith.addf %1, %132 : vector<8x32xf32>
    %cst_44 = arith.constant dense<0.000000e+00> : vector<8xf32>
    %134 = vector.multi_reduction <add>, %133, %cst_44 [1] : vector<8x32xf32> to vector<8xf32>
    %135 = vector.shape_cast %134 : vector<8xf32> to vector<8x1xf32>
    %cst_45 = arith.constant 3.200000e+01 : f32
    %136 = vector.broadcast %cst_45 : f32 to vector<8x1xf32>
    %137 = arith.divf %135, %136 : vector<8x1xf32>
    %138 = vector.broadcast %137 : vector<8x1xf32> to vector<8x32xf32>
    %139 = arith.subf %133, %138 : vector<8x32xf32>
    %140 = arith.mulf %139, %139 : vector<8x32xf32>
    %cst_46 = arith.constant dense<0.000000e+00> : vector<8xf32>
    %141 = vector.multi_reduction <add>, %140, %cst_46 [1] : vector<8x32xf32> to vector<8xf32>
    %142 = vector.shape_cast %141 : vector<8xf32> to vector<8x1xf32>
    %cst_47 = arith.constant 0.0322580636 : f32
    %143 = vector.broadcast %cst_47 : f32 to vector<8x1xf32>
    %144 = arith.mulf %142, %143 : vector<8x1xf32>
    %145 = math.sqrt %144 : vector<8x1xf32>
    %cst_48 = arith.constant 9.99999997E-7 : f32
    %146 = vector.broadcast %cst_48 : f32 to vector<8x1xf32>
    %147 = arith.addf %145, %146 : vector<8x1xf32>
    %148 = tpu.reciprocal %147 : vector<8x1xf32> -> vector<8x1xf32>
    %149 = vector.broadcast %21 : f32 to vector<8x1xf32>
    %150 = arith.mulf %149, %148 : vector<8x1xf32>
    %151 = vector.broadcast %150 : vector<8x1xf32> to vector<8x32xf32>
    %152 = arith.mulf %139, %151 : vector<8x32xf32>
    %153 = vector.broadcast %22 : f32 to vector<8x32xf32>
    %154 = arith.addf %152, %153 : vector<8x32xf32>
    %155 = arith.truncf %154 : vector<8x32xf32> to vector<8x32xbf16>
    %c0_49 = arith.constant 0 : index
    %c0_50 = arith.constant 0 : index
    %156 = vector.load %arg9[%c0_49, %c0_50] : memref<32x32xbf16, #tpu.memory_space<vmem>>, vector<32x32xbf16>
    %cst_51 = arith.constant dense<0.000000e+00> : vector<8x32xf32>
    %157 = tpu.matmul %155, %156, %cst_51 {dimension_numbers = #tpu.dot_dimension_numbers<[1], [0], [0], [1], [0, 0, 1, 1], [], []>} : vector<8x32xbf16>, vector<32x32xbf16>, vector<8x32xf32> -> vector<8x32xf32>
    %c0_52 = arith.constant 0 : index
    %c0_53 = arith.constant 0 : index
    %158 = vector.load %arg10[%c0_52, %c0_53] : memref<1x32xf32, #tpu.memory_space<vmem>>, vector<1x32xf32>
    %159 = vector.broadcast %158 : vector<1x32xf32> to vector<8x32xf32>
    %160 = arith.addf %157, %159 : vector<8x32xf32>
    %c0_54 = arith.constant 0 : index
    %c0_55 = arith.constant 0 : index
    %161 = vector.load %arg11[%c0_54, %c0_55] : memref<32x64xbf16, #tpu.memory_space<vmem>>, vector<32x64xbf16>
    %cst_56 = arith.constant dense<0.000000e+00> : vector<8x64xf32>
    %162 = tpu.matmul %4, %161, %cst_56 {dimension_numbers = #tpu.dot_dimension_numbers<[1], [0], [0], [1], [0, 0, 1, 1], [], []>} : vector<8x32xbf16>, vector<32x64xbf16>, vector<8x64xf32> -> vector<8x64xf32>
    %c0_57 = arith.constant 0 : index
    %c0_58 = arith.constant 0 : index
    %163 = vector.load %arg12[%c0_57, %c0_58] : memref<1x64xf32, #tpu.memory_space<vmem>>, vector<1x64xf32>
    %164 = vector.broadcast %163 : vector<1x64xf32> to vector<8x64xf32>
    %165 = arith.addf %162, %164 : vector<8x64xf32>
    %166 = vector.extract_strided_slice %165 {offsets = [0, 0], sizes = [8, 32], strides = [1, 1]} : vector<8x64xf32> to vector<8x32xf32>
    %167 = vector.extract_strided_slice %165 {offsets = [0, 32], sizes = [8, 32], strides = [1, 1]} : vector<8x64xf32> to vector<8x32xf32>
    %168 = arith.truncf %160 : vector<8x32xf32> to vector<8x32xbf16>
    %169 = arith.truncf %166 : vector<8x32xf32> to vector<8x32xbf16>
    %170 = arith.truncf %167 : vector<8x32xf32> to vector<8x32xbf16>
    %171 = vector.extract_strided_slice %168 {offsets = [0, 0], sizes = [8, 8], strides = [1, 1]} : vector<8x32xbf16> to vector<8x8xbf16>
    %172 = vector.extract_strided_slice %169 {offsets = [0, 0], sizes = [8, 8], strides = [1, 1]} : vector<8x32xbf16> to vector<8x8xbf16>
    %cst_59 = arith.constant dense<0.000000e+00> : vector<8x8xf32>
    %173 = tpu.matmul %171, %172, %cst_59 {dimension_numbers = #tpu.dot_dimension_numbers<[1], [1], [0], [0], [0, 0, 1, 0], [], []>} : vector<8x8xbf16>, vector<8x8xbf16>, vector<8x8xf32> -> vector<8x8xf32>
    %174 = vector.broadcast %18 : vector<1x8xf32> to vector<8x8xf32>
    %175 = arith.addf %173, %174 : vector<8x8xf32>
    %cst_60 = arith.constant dense<0xFF800000> : vector<8xf32>
    %176 = vector.multi_reduction <maximumf>, %175, %cst_60 [1] : vector<8x8xf32> to vector<8xf32>
    %177 = vector.shape_cast %176 : vector<8xf32> to vector<8x1xf32>
    %178 = vector.broadcast %177 : vector<8x1xf32> to vector<8x8xf32>
    %179 = arith.subf %175, %178 : vector<8x8xf32>
    %180 = math.exp %179 : vector<8x8xf32>
    %cst_61 = arith.constant dense<0.000000e+00> : vector<8xf32>
    %181 = vector.multi_reduction <add>, %180, %cst_61 [1] : vector<8x8xf32> to vector<8xf32>
    %182 = vector.shape_cast %181 : vector<8xf32> to vector<8x1xf32>
    %183 = tpu.reciprocal %182 {approx = true} : vector<8x1xf32> -> vector<8x1xf32>
    %184 = vector.broadcast %183 : vector<8x1xf32> to vector<8x8xf32>
    %185 = arith.mulf %180, %184 : vector<8x8xf32>
    %186 = arith.truncf %185 : vector<8x8xf32> to vector<8x8xbf16>
    %187 = vector.extract_strided_slice %170 {offsets = [0, 0], sizes = [8, 8], strides = [1, 1]} : vector<8x32xbf16> to vector<8x8xbf16>
    %cst_62 = arith.constant dense<0.000000e+00> : vector<8x8xf32>
    %188 = tpu.matmul %186, %187, %cst_62 {dimension_numbers = #tpu.dot_dimension_numbers<[1], [0], [0], [1], [0, 0, 1, 1], [], []>} : vector<8x8xbf16>, vector<8x8xbf16>, vector<8x8xf32> -> vector<8x8xf32>
    %189 = vector.extract_strided_slice %168 {offsets = [0, 8], sizes = [8, 8], strides = [1, 1]} : vector<8x32xbf16> to vector<8x8xbf16>
    %190 = vector.extract_strided_slice %169 {offsets = [0, 8], sizes = [8, 8], strides = [1, 1]} : vector<8x32xbf16> to vector<8x8xbf16>
    %cst_63 = arith.constant dense<0.000000e+00> : vector<8x8xf32>
    %191 = tpu.matmul %189, %190, %cst_63 {dimension_numbers = #tpu.dot_dimension_numbers<[1], [1], [0], [0], [0, 0, 1, 0], [], []>} : vector<8x8xbf16>, vector<8x8xbf16>, vector<8x8xf32> -> vector<8x8xf32>
    %192 = vector.broadcast %18 : vector<1x8xf32> to vector<8x8xf32>
    %193 = arith.addf %191, %192 : vector<8x8xf32>
    %cst_64 = arith.constant dense<0xFF800000> : vector<8xf32>
    %194 = vector.multi_reduction <maximumf>, %193, %cst_64 [1] : vector<8x8xf32> to vector<8xf32>
    %195 = vector.shape_cast %194 : vector<8xf32> to vector<8x1xf32>
    %196 = vector.broadcast %195 : vector<8x1xf32> to vector<8x8xf32>
    %197 = arith.subf %193, %196 : vector<8x8xf32>
    %198 = math.exp %197 : vector<8x8xf32>
    %cst_65 = arith.constant dense<0.000000e+00> : vector<8xf32>
    %199 = vector.multi_reduction <add>, %198, %cst_65 [1] : vector<8x8xf32> to vector<8xf32>
    %200 = vector.shape_cast %199 : vector<8xf32> to vector<8x1xf32>
    %201 = tpu.reciprocal %200 {approx = true} : vector<8x1xf32> -> vector<8x1xf32>
    %202 = vector.broadcast %201 : vector<8x1xf32> to vector<8x8xf32>
    %203 = arith.mulf %198, %202 : vector<8x8xf32>
    %204 = arith.truncf %203 : vector<8x8xf32> to vector<8x8xbf16>
    %205 = vector.extract_strided_slice %170 {offsets = [0, 8], sizes = [8, 8], strides = [1, 1]} : vector<8x32xbf16> to vector<8x8xbf16>
    %cst_66 = arith.constant dense<0.000000e+00> : vector<8x8xf32>
    %206 = tpu.matmul %204, %205, %cst_66 {dimension_numbers = #tpu.dot_dimension_numbers<[1], [0], [0], [1], [0, 0, 1, 1], [], []>} : vector<8x8xbf16>, vector<8x8xbf16>, vector<8x8xf32> -> vector<8x8xf32>
    %207 = vector.extract_strided_slice %168 {offsets = [0, 16], sizes = [8, 8], strides = [1, 1]} : vector<8x32xbf16> to vector<8x8xbf16>
    %208 = vector.extract_strided_slice %169 {offsets = [0, 16], sizes = [8, 8], strides = [1, 1]} : vector<8x32xbf16> to vector<8x8xbf16>
    %cst_67 = arith.constant dense<0.000000e+00> : vector<8x8xf32>
    %209 = tpu.matmul %207, %208, %cst_67 {dimension_numbers = #tpu.dot_dimension_numbers<[1], [1], [0], [0], [0, 0, 1, 0], [], []>} : vector<8x8xbf16>, vector<8x8xbf16>, vector<8x8xf32> -> vector<8x8xf32>
    %210 = vector.broadcast %18 : vector<1x8xf32> to vector<8x8xf32>
    %211 = arith.addf %209, %210 : vector<8x8xf32>
    %cst_68 = arith.constant dense<0xFF800000> : vector<8xf32>
    %212 = vector.multi_reduction <maximumf>, %211, %cst_68 [1] : vector<8x8xf32> to vector<8xf32>
    %213 = vector.shape_cast %212 : vector<8xf32> to vector<8x1xf32>
    %214 = vector.broadcast %213 : vector<8x1xf32> to vector<8x8xf32>
    %215 = arith.subf %211, %214 : vector<8x8xf32>
    %216 = math.exp %215 : vector<8x8xf32>
    %cst_69 = arith.constant dense<0.000000e+00> : vector<8xf32>
    %217 = vector.multi_reduction <add>, %216, %cst_69 [1] : vector<8x8xf32> to vector<8xf32>
    %218 = vector.shape_cast %217 : vector<8xf32> to vector<8x1xf32>
    %219 = tpu.reciprocal %218 {approx = true} : vector<8x1xf32> -> vector<8x1xf32>
    %220 = vector.broadcast %219 : vector<8x1xf32> to vector<8x8xf32>
    %221 = arith.mulf %216, %220 : vector<8x8xf32>
    %222 = arith.truncf %221 : vector<8x8xf32> to vector<8x8xbf16>
    %223 = vector.extract_strided_slice %170 {offsets = [0, 16], sizes = [8, 8], strides = [1, 1]} : vector<8x32xbf16> to vector<8x8xbf16>
    %cst_70 = arith.constant dense<0.000000e+00> : vector<8x8xf32>
    %224 = tpu.matmul %222, %223, %cst_70 {dimension_numbers = #tpu.dot_dimension_numbers<[1], [0], [0], [1], [0, 0, 1, 1], [], []>} : vector<8x8xbf16>, vector<8x8xbf16>, vector<8x8xf32> -> vector<8x8xf32>
    %225 = vector.extract_strided_slice %168 {offsets = [0, 24], sizes = [8, 8], strides = [1, 1]} : vector<8x32xbf16> to vector<8x8xbf16>
    %226 = vector.extract_strided_slice %169 {offsets = [0, 24], sizes = [8, 8], strides = [1, 1]} : vector<8x32xbf16> to vector<8x8xbf16>
    %cst_71 = arith.constant dense<0.000000e+00> : vector<8x8xf32>
    %227 = tpu.matmul %225, %226, %cst_71 {dimension_numbers = #tpu.dot_dimension_numbers<[1], [1], [0], [0], [0, 0, 1, 0], [], []>} : vector<8x8xbf16>, vector<8x8xbf16>, vector<8x8xf32> -> vector<8x8xf32>
    %228 = vector.broadcast %18 : vector<1x8xf32> to vector<8x8xf32>
    %229 = arith.addf %227, %228 : vector<8x8xf32>
    %cst_72 = arith.constant dense<0xFF800000> : vector<8xf32>
    %230 = vector.multi_reduction <maximumf>, %229, %cst_72 [1] : vector<8x8xf32> to vector<8xf32>
    %231 = vector.shape_cast %230 : vector<8xf32> to vector<8x1xf32>
    %232 = vector.broadcast %231 : vector<8x1xf32> to vector<8x8xf32>
    %233 = arith.subf %229, %232 : vector<8x8xf32>
    %234 = math.exp %233 : vector<8x8xf32>
    %cst_73 = arith.constant dense<0.000000e+00> : vector<8xf32>
    %235 = vector.multi_reduction <add>, %234, %cst_73 [1] : vector<8x8xf32> to vector<8xf32>
    %236 = vector.shape_cast %235 : vector<8xf32> to vector<8x1xf32>
    %237 = tpu.reciprocal %236 {approx = true} : vector<8x1xf32> -> vector<8x1xf32>
    %238 = vector.broadcast %237 : vector<8x1xf32> to vector<8x8xf32>
    %239 = arith.mulf %234, %238 : vector<8x8xf32>
    %240 = arith.truncf %239 : vector<8x8xf32> to vector<8x8xbf16>
    %241 = vector.extract_strided_slice %170 {offsets = [0, 24], sizes = [8, 8], strides = [1, 1]} : vector<8x32xbf16> to vector<8x8xbf16>
    %cst_74 = arith.constant dense<0.000000e+00> : vector<8x8xf32>
    %242 = tpu.matmul %240, %241, %cst_74 {dimension_numbers = #tpu.dot_dimension_numbers<[1], [0], [0], [1], [0, 0, 1, 1], [], []>} : vector<8x8xbf16>, vector<8x8xbf16>, vector<8x8xf32> -> vector<8x8xf32>
    %243 = tpu.concatenate %188, %206, %224, %242 in 1 : vector<8x8xf32>, vector<8x8xf32>, vector<8x8xf32>, vector<8x8xf32> -> vector<8x32xf32>
    %244 = arith.truncf %243 : vector<8x32xf32> to vector<8x32xbf16>
    %c0_75 = arith.constant 0 : index
    %c0_76 = arith.constant 0 : index
    %245 = vector.load %arg13[%c0_75, %c0_76] : memref<32x32xbf16, #tpu.memory_space<vmem>>, vector<32x32xbf16>
    %cst_77 = arith.constant dense<0.000000e+00> : vector<8x32xf32>
    %246 = tpu.matmul %244, %245, %cst_77 {dimension_numbers = #tpu.dot_dimension_numbers<[1], [0], [0], [1], [0, 0, 1, 1], [], []>} : vector<8x32xbf16>, vector<32x32xbf16>, vector<8x32xf32> -> vector<8x32xf32>
    %c0_78 = arith.constant 0 : index
    %c0_79 = arith.constant 0 : index
    %247 = vector.load %arg14[%c0_78, %c0_79] : memref<1x32xf32, #tpu.memory_space<vmem>>, vector<1x32xf32>
    %248 = vector.broadcast %247 : vector<1x32xf32> to vector<8x32xf32>
    %249 = arith.addf %246, %248 : vector<8x32xf32>
    %250 = arith.addf %133, %249 : vector<8x32xf32>
    %cst_80 = arith.constant dense<0.000000e+00> : vector<8xf32>
    %251 = vector.multi_reduction <add>, %250, %cst_80 [1] : vector<8x32xf32> to vector<8xf32>
    %252 = vector.shape_cast %251 : vector<8xf32> to vector<8x1xf32>
    %cst_81 = arith.constant 3.200000e+01 : f32
    %253 = vector.broadcast %cst_81 : f32 to vector<8x1xf32>
    %254 = arith.divf %252, %253 : vector<8x1xf32>
    %255 = vector.broadcast %254 : vector<8x1xf32> to vector<8x32xf32>
    %256 = arith.subf %250, %255 : vector<8x32xf32>
    %257 = arith.mulf %256, %256 : vector<8x32xf32>
    %cst_82 = arith.constant dense<0.000000e+00> : vector<8xf32>
    %258 = vector.multi_reduction <add>, %257, %cst_82 [1] : vector<8x32xf32> to vector<8xf32>
    %259 = vector.shape_cast %258 : vector<8xf32> to vector<8x1xf32>
    %cst_83 = arith.constant 0.0322580636 : f32
    %260 = vector.broadcast %cst_83 : f32 to vector<8x1xf32>
    %261 = arith.mulf %259, %260 : vector<8x1xf32>
    %262 = math.sqrt %261 : vector<8x1xf32>
    %cst_84 = arith.constant 9.99999997E-7 : f32
    %263 = vector.broadcast %cst_84 : f32 to vector<8x1xf32>
    %264 = arith.addf %262, %263 : vector<8x1xf32>
    %265 = tpu.reciprocal %264 : vector<8x1xf32> -> vector<8x1xf32>
    %266 = vector.broadcast %23 : f32 to vector<8x1xf32>
    %267 = arith.mulf %266, %265 : vector<8x1xf32>
    %268 = vector.broadcast %267 : vector<8x1xf32> to vector<8x32xf32>
    %269 = arith.mulf %256, %268 : vector<8x32xf32>
    %270 = vector.broadcast %24 : f32 to vector<8x32xf32>
    %271 = arith.addf %269, %270 : vector<8x32xf32>
    %272 = arith.truncf %271 : vector<8x32xf32> to vector<8x32xbf16>
    %c0_85 = arith.constant 0 : index
    %c0_86 = arith.constant 0 : index
    %273 = vector.load %arg15[%c0_85, %c0_86] : memref<32x64xbf16, #tpu.memory_space<vmem>>, vector<32x64xbf16>
    %cst_87 = arith.constant dense<0.000000e+00> : vector<8x64xf32>
    %274 = tpu.matmul %272, %273, %cst_87 {dimension_numbers = #tpu.dot_dimension_numbers<[1], [0], [0], [1], [0, 0, 1, 1], [], []>} : vector<8x32xbf16>, vector<32x64xbf16>, vector<8x64xf32> -> vector<8x64xf32>
    %c0_88 = arith.constant 0 : index
    %c0_89 = arith.constant 0 : index
    %275 = vector.load %arg16[%c0_88, %c0_89] : memref<1x64xf32, #tpu.memory_space<vmem>>, vector<1x64xf32>
    %276 = vector.broadcast %275 : vector<1x64xf32> to vector<8x64xf32>
    %277 = arith.addf %274, %276 : vector<8x64xf32>
    %cst_90 = arith.constant 0.000000e+00 : f32
    %278 = vector.broadcast %cst_90 : f32 to vector<8x64xf32>
    %279 = arith.maximumf %277, %278 : vector<8x64xf32>
    %280 = arith.truncf %279 : vector<8x64xf32> to vector<8x64xbf16>
    %c0_91 = arith.constant 0 : index
    %c0_92 = arith.constant 0 : index
    %281 = vector.load %arg17[%c0_91, %c0_92] : memref<64x32xbf16, #tpu.memory_space<vmem>>, vector<64x32xbf16>
    %cst_93 = arith.constant dense<0.000000e+00> : vector<8x32xf32>
    %282 = tpu.matmul %280, %281, %cst_93 {dimension_numbers = #tpu.dot_dimension_numbers<[1], [0], [0], [1], [0, 0, 1, 1], [], []>} : vector<8x64xbf16>, vector<64x32xbf16>, vector<8x32xf32> -> vector<8x32xf32>
    %c0_94 = arith.constant 0 : index
    %c0_95 = arith.constant 0 : index
    %283 = vector.load %arg18[%c0_94, %c0_95] : memref<1x32xf32, #tpu.memory_space<vmem>>, vector<1x32xf32>
    %284 = vector.broadcast %283 : vector<1x32xf32> to vector<8x32xf32>
    %285 = arith.addf %282, %284 : vector<8x32xf32>
    %286 = arith.addf %250, %285 : vector<8x32xf32>
    %c0_96 = arith.constant 0 : index
    %c0_97 = arith.constant 0 : index
    %c0_98 = arith.constant 0 : index
    %287 = vector.load %arg19[%c0_96, %c0_97, %c0_98] : memref<1x8x32xf32, #tpu.memory_space<vmem>>, vector<1x8x32xf32>
    %288 = vector.shape_cast %287 : vector<1x8x32xf32> to vector<8x32xf32>
    %289 = vector.shape_cast %286 : vector<8x32xf32> to vector<1x8x32xf32>
    tpu.vector_store %arg19[%c0_96, %c0_97, %c0_98], %289 {strides = array<i32>} : memref<1x8x32xf32, #tpu.memory_space<vmem>>, vector<1x8x32xf32>,
    return
  }
  func.func @transform_0(%arg0: i32) -> i32 {
    %c0_i32 = arith.constant 0 : i32
    %c0_i32_0 = arith.constant 0 : i32
    return %c0_i32 : i32
  }
  func.func @transform_1(%arg0: i32) -> (i32, i32, i32) {
    %c0_i32 = arith.constant 0 : i32
    %c0_i32_0 = arith.constant 0 : i32
    %c0_i32_1 = arith.constant 0 : i32
    return %arg0, %c0_i32, %c0_i32_0 : i32, i32, i32
  }
  func.func @transform_2(%arg0: i32) -> (i32, i32, i32) {
    %c0_i32 = arith.constant 0 : i32
    %c0_i32_0 = arith.constant 0 : i32
    %c0_i32_1 = arith.constant 0 : i32
    return %arg0, %c0_i32, %c0_i32_0 : i32, i32, i32
  }
  func.func @transform_3(%arg0: i32) -> (i32, i32, i32) {
    %c0_i32 = arith.constant 0 : i32
    %c0_i32_0 = arith.constant 0 : i32
    %c0_i32_1 = arith.constant 0 : i32
    return %arg0, %c0_i32, %c0_i32_0 : i32, i32, i32
  }
  func.func @transform_4(%arg0: i32) -> (i32, i32) {
    %c0_i32 = arith.constant 0 : i32
    %c0_i32_0 = arith.constant 0 : i32
    %c0_i32_1 = arith.constant 0 : i32
    return %c0_i32, %c0_i32_0 : i32, i32
  }
  func.func @transform_5(%arg0: i32) -> (i32, i32) {
    %c0_i32 = arith.constant 0 : i32
    %c0_i32_0 = arith.constant 0 : i32
    %c0_i32_1 = arith.constant 0 : i32
    return %c0_i32, %c0_i32_0 : i32, i32
  }
  func.func @transform_6(%arg0: i32) -> (i32, i32) {
    %c0_i32 = arith.constant 0 : i32
    %c0_i32_0 = arith.constant 0 : i32
    %c0_i32_1 = arith.constant 0 : i32
    return %c0_i32, %c0_i32_0 : i32, i32
  }
  func.func @transform_7(%arg0: i32) -> (i32, i32) {
    %c0_i32 = arith.constant 0 : i32
    %c0_i32_0 = arith.constant 0 : i32
    %c0_i32_1 = arith.constant 0 : i32
    return %c0_i32, %c0_i32_0 : i32, i32
  }
  func.func @transform_8(%arg0: i32) -> (i32, i32) {
    %c0_i32 = arith.constant 0 : i32
    %c0_i32_0 = arith.constant 0 : i32
    %c0_i32_1 = arith.constant 0 : i32
    return %c0_i32, %c0_i32_0 : i32, i32
  }
  func.func @transform_9(%arg0: i32) -> (i32, i32) {
    %c0_i32 = arith.constant 0 : i32
    %c0_i32_0 = arith.constant 0 : i32
    %c0_i32_1 = arith.constant 0 : i32
    return %c0_i32, %c0_i32_0 : i32, i32
  }
  func.func @transform_10(%arg0: i32) -> (i32, i32) {
    %c0_i32 = arith.constant 0 : i32
    %c0_i32_0 = arith.constant 0 : i32
    %c0_i32_1 = arith.constant 0 : i32
    return %c0_i32, %c0_i32_0 : i32, i32
  }
  func.func @transform_11(%arg0: i32) -> (i32, i32) {
    %c0_i32 = arith.constant 0 : i32
    %c0_i32_0 = arith.constant 0 : i32
    %c0_i32_1 = arith.constant 0 : i32
    return %c0_i32, %c0_i32_0 : i32, i32
  }
  func.func @transform_12(%arg0: i32) -> (i32, i32) {
    %c0_i32 = arith.constant 0 : i32
    %c0_i32_0 = arith.constant 0 : i32
    %c0_i32_1 = arith.constant 0 : i32
    return %c0_i32, %c0_i32_0 : i32, i32
  }
  func.func @transform_13(%arg0: i32) -> (i32, i32) {
    %c0_i32 = arith.constant 0 : i32
    %c0_i32_0 = arith.constant 0 : i32
    %c0_i32_1 = arith.constant 0 : i32
    return %c0_i32, %c0_i32_0 : i32, i32
  }
  func.func @transform_14(%arg0: i32) -> (i32, i32) {
    %c0_i32 = arith.constant 0 : i32
    %c0_i32_0 = arith.constant 0 : i32
    %c0_i32_1 = arith.constant 0 : i32
    return %c0_i32, %c0_i32_0 : i32, i32
  }
  func.func @transform_15(%arg0: i32) -> (i32, i32) {
    %c0_i32 = arith.constant 0 : i32
    %c0_i32_0 = arith.constant 0 : i32
    %c0_i32_1 = arith.constant 0 : i32
    return %c0_i32, %c0_i32_0 : i32, i32
  }
  func.func @transform_16(%arg0: i32) -> (i32, i32) {
    %c0_i32 = arith.constant 0 : i32
    %c0_i32_0 = arith.constant 0 : i32
    %c0_i32_1 = arith.constant 0 : i32
    return %c0_i32, %c0_i32_0 : i32, i32
  }
  func.func @transform_17(%arg0: i32) -> (i32, i32) {
    %c0_i32 = arith.constant 0 : i32
    %c0_i32_0 = arith.constant 0 : i32
    %c0_i32_1 = arith.constant 0 : i32
    return %c0_i32, %c0_i32_0 : i32, i32
  }
  func.func @transform_18(%arg0: i32) -> (i32, i32, i32) {
    %c0_i32 = arith.constant 0 : i32
    %c0_i32_0 = arith.constant 0 : i32
    %c0_i32_1 = arith.constant 0 : i32
    return %arg0, %c0_i32, %c0_i32_0 : i32, i32, i32
  }
}

</mosaic_0001>

<bundles_post_ra>
// kernel: tpu_custom_call.1
= control target key start
LH: loop header
LB: loop body
LE: loop exit
PB: predicated region body
PF: predicated region fallthrough
CT: control target
= control target key end

     0   :  { %s3875_s0 = inlined_call_operand.vmem [shape: f32[6], index: 0, kind: input, shape index: {}]   ;;  %s3876_s1 = inlined_call_operand.vmem [shape: f32[2,8,32], index: 1, kind: input, shape index: {}]   ;;  %s3877_s2 = inlined_call_operand.vmem [shape: f32[2,8,32], index: 2, kind: input, shape index: {}]   ;;  %s3878_s3 = inlined_call_operand.vmem [shape: s8[2,1,8], index: 3, kind: input, shape index: {}]   ;;  %s3879_s4 = inlined_call_operand.vmem [shape: bf16[32,96], index: 4, kind: input, shape index: {}]   ;;  %s3880_s5 = inlined_call_operand.hbm [shape: f32[1,96], index: 5, kind: input, shape index: {}]   ;;  %s3881_s6 = inlined_call_operand.hbm [shape: bf16[32,32], index: 6, kind: input, shape index: {}]   ;;  %s3882_s7 = inlined_call_operand.hbm [shape: f32[1,32], index: 7, kind: input, shape index: {}]   ;;  %s3883_s8 = inlined_call_operand.vmem [shape: bf16[32,32], index: 8, kind: input, shape index: {}]   ;;  %s3884_s9 = inlined_call_operand.hbm [shape: f32[1,32], index: 9, kind: input, shape index: {}]   ;;  %s3885_s10 = inlined_call_operand.hbm [shape: bf16[32,64], index: 10, kind: input, shape index: {}]   ;;  %s3886_s11 = inlined_call_operand.hbm [shape: f32[1,64], index: 11, kind: input, shape index: {}]   ;;  %s3887_s12 = inlined_call_operand.vmem [shape: bf16[32,32], index: 12, kind: input, shape index: {}]   ;;  %s3888_s13 = inlined_call_operand.vmem [shape: f32[1,32], index: 13, kind: input, shape index: {}]   ;;  %s3889_s14 = inlined_call_operand.hbm [shape: bf16[32,64], index: 14, kind: input, shape index: {}]   ;;  %s3890_s15 = inlined_call_operand.vmem [shape: f32[1,64], index: 15, kind: input, shape index: {}]   ;;  %s3891_s16 = inlined_call_operand.vmem [shape: bf16[64,32], index: 16, kind: input, shape index: {}]   ;;  %s3892_s17 = inlined_call_operand.vmem [shape: f32[1,32], index: 17, kind: input, shape index: {}]   ;;  %s3893_s18 = inlined_call_operand.hbm [shape: f32[2,8,32], index: 18, kind: output, shape index: {}]  }
   0x1   :  { %3912 = sst [smem:[#allocation31_spill]] %s3875_s0 }
   0x2   :  { %3913 = sst [smem:[#allocation32_spill]] %s3876_s1 }
   0x3   :  { %3914 = sst [smem:[#allocation33_spill]] %s3877_s2 }
   0x4   :  { %3915 = sst [smem:[#allocation34_spill]] %s3890_s15 }
   0x5   :  { %3916 = sst [smem:[#allocation35_spill]] %s3892_s17 }
   0x6   :  { %3917 = sst [smem:[#allocation36_spill]] %s3893_s18 }
   0x7   :  { %23 = vsyncpa [#allocation5], 0 }
   0x8   :  { %24 = vsyncpa [#allocation3], 0 }
   0x9   :  { %25 = vsyncpa [#allocation8], 0 }
   0xa   :  { %26 = vsyncpa [#allocation11], 0 }
   0xb   :  { %27 = vsyncpa [#allocation14], 0 }
   0xc   :  { %28 = vsyncpa [#allocation4], 0 }
   0xd   :  { %30 = vsyncpa [#allocation4 + $0x1], 0  ;;  %s3294_s27 = smov 0   ;;  %s3296_s28 = smov 0  }
   0xe   :  { %s3298_s29 = smov 0   ;;  %s3300_s30 = smov 0  }
   0xf LB: > { %3918 = sst [smem:[#allocation23_spill]] %s3157_s27  ;;  %s3315_s0 = sadd.s32 4294967295, %s3169_s30   ;;  %s3169_s30 = sphi %s3300_s30, %s3960_s30   ;;  %s3165_s29 = sphi %s3298_s29, %s3963_s29   ;;  %s3161_s28 = sphi %s3296_s28, %s3962_s28   ;;  %s3157_s27 = sphi %s3294_s27, %s3961_s27  }
  0x10   : > { %3919 = sst [smem:[#allocation24_spill]] %s3161_s28  ;;  %s2388_s19 = sadd.s32 4294967294, %s3169_s30  }
  0x11   : > { %3920 = sst [smem:[#allocation25_spill]] %s3165_s29  ;;  %s3319_s1 = sadd.s32 1, %s3169_s30  }
  0x12   : > { %3921 = sst [smem:[#allocation26_spill]] %s3169_s30  ;;  %s436_s20 = sadd.s32 1, %s3165_s29 }
  0x13   : > { %3922 = sst [smem:[#allocation27_spill]] %s3319_s1  ;;  %s433_s21 = ssub.s32 %s3169_s30, %s3319_s1 }
  0x14   : > { %p446_p0 = scmp.ne.s32.totalorder %s3165_s29, %s3161_s28  ;;  %p434_p1 = scmp.eq.s32.totalorder %s433_s21, 0 }
  0x15   : > { %p447_p2 = scmp.eq.s32.totalorder %s3315_s0, 1  ;;  %p452_p3 = scmp.ne.s32.totalorder %s3161_s28, %s3157_s27 }
  0x16   : > { %p453_p4 = scmp.eq.s32.totalorder %s2388_s19, 1  ;;  %p2389_p7 = scmp.ge.s32.totalorder %s3169_s30, 1 }
  0x17   : > { %s3330_s22 = scalar_select %p434_p1, %s3165_s29, %s436_s20  }
  0x18   : > { %p3332_p5 = por %p447_p2, %p446_p0  ;;  %p3336_p6 = por %p453_p4, %p452_p3 }
  0x19   : > { %3923 = sst [smem:[#allocation28_spill]] %s3330_s22  ;;  %p460_p8 = scmp.lt.s32.totalorder %s3169_s30, 3 }
  0x1a   : > { %s3924_s2 = scalar_select %p3332_p5, 1, 0 }
  0x1b   : > { %s3926_s23 = scalar_select %p3336_p6, 1, 0 }
  0x1c   : > { %3925 = sst [smem:[#allocation29_spill]] %s3924_s2  ;;  %p3901_p9 = scmp.eq.s32.totalorder %s3315_s0, 0 }
  0x1d   : > { %3927 = sst [smem:[#allocation30_spill]] %s3926_s23  ;;  %p3343_p10 = pnand %p2389_p7, %p460_p8 }
  0x1e   : > { %s3171_s25 = smov [#allocation7]   ;;  %s3172_s20 = smov [#allocation10]  }
  0x1f   : > { %s3928_s24 = scalar_select %p3343_p10, 1, 0 }
  0x20   : > { %s497_s26 = sshll.u32 %s3171_s25, 4  ;;  %p2711_p11 = pneg %p3343_p10  ;;  %s3349_s26 = int_to_ptr.vmem [resolvable:$true] %s497_s26 }
  0x21   : > { %s525_s21 = sshll.u32 %s3172_s20, 4  ;;  %s3173_s22 = smov [#allocation13]   ;;  %s3357_s21 = int_to_ptr.vmem [resolvable:$true] %s525_s21 }
  0x22   : > { %p3353_p12 = pnand %p3901_p9, %p2711_p11  ;;  %s3359_s29 = sshll.u32 %s3173_s22, 4  ;;  %s550_s29 = int_to_ptr.vmem [resolvable:$true] %s3359_s29 }
  0x23   : > { %s2876_s25 = scalar_lea.hbm %s3881_s6, 256 }
  0x24   : > { %p2877_p13 = scmp.ne.s32.totalorder %s3881_s6, %s2876_s25  ;;  %p3369_p0 = pneg %p3353_p12 }
  0x25   : > { %p2883_p3 = scmp.lt.u32.totalorder %s2876_s25, %s3881_s6 }
  0x26   : > { %p2879_p1 = pnand %p3369_p0, %p2877_p13 }
  0x28   : > { %p2880_p2 = pneg %p2879_p1 }
  0x2a   : > { %p2885_p4 = pnand %p2883_p3, %p2880_p2 }
  0x2c   : > { %2888 = shalt.err (!%p2885_p4)
}
  0x2d   : > { %s2889_s27 = scalar_lea.vmem %s3349_s26, 256  ;;  %p2897_p9 = scmp.lt.s32.totalorder %s3349_s26, %s3349_s26 }
  0x2e   : > { %p2890_p7 = scmp.ne.s32.totalorder %s3349_s26, %s2889_s27  ;;  %p2898_p6 = scmp.lt.s32.totalorder %s2889_s27, %s2889_s27 }
  0x30   : > { %p2892_p8 = pnand %p2890_p7, %p3369_p0  ;;  %p2899_p13 = por %p2898_p6, %p2897_p9 }
  0x32   : > { %p2893_p11 = pneg %p2892_p8 }
  0x34   : > { %p2900_p1 = pnand %p2899_p13, %p2893_p11 }
  0x36   : > { %2903 = shalt.err (!%p2900_p1)
}
  0x37   : > { %s3905_s30 = smov 64   ;;  %s3175_s1 = smov 4  }
  0x38   : > { %2720 = dma.hbm_to_vmem [thread:$0]  (!%p3353_p12), %s3881_s6, 256, %s3349_s26, [#allocation8], %s3905_s30, %s3905_s30, %s3175_s1  }
  0x39   : > { %s2904_s27 = scalar_lea.hbm %s3884_s9, 16 }
  0x3a   : > { %p2905_p6 = scmp.ne.s32.totalorder %s3884_s9, %s2904_s27  ;;  %p2911_p3 = scmp.lt.u32.totalorder %s2904_s27, %s3884_s9 }
  0x3c   : > { %p2907_p9 = pnand %p2905_p6, %p3369_p0 }
  0x3e   : > { %p2908_p2 = pneg %p2907_p9 }
  0x40   : > { %p2913_p4 = pnand %p2911_p3, %p2908_p2 }
  0x42   : > { %2916 = shalt.err (!%p2913_p4)
}
  0x43   : > { %s2917_s26 = scalar_lea.vmem %s3357_s21, 16  ;;  %s2924_s17 = scalar_lea.vmem %s3357_s21, 32 }
  0x44   : > { %p2918_p7 = scmp.ne.s32.totalorder %s3357_s21, %s2917_s26  ;;  %p2925_p13 = scmp.lt.s32.totalorder %s3357_s21, %s3357_s21 }
  0x45   : > { %p2926_p1 = scmp.lt.s32.totalorder %s2924_s17, %s2917_s26 }
  0x46   : > { %p2920_p8 = pnand %p2918_p7, %p3369_p0 }
  0x47   : > { %p2927_p6 = por %p2926_p1, %p2925_p13 }
  0x48   : > { %p2921_p11 = pneg %p2920_p8 }
  0x4a   : > { %p2928_p9 = pnand %p2927_p6, %p2921_p11 }
  0x4c   : > { %2931 = shalt.err (!%p2928_p9)
}
  0x4d   : > { %2726 = dma.hbm_to_vmem [thread:$0]  (!%p3353_p12), %s3884_s9, 16, %s3357_s21, [#allocation11]  }
  0x4e   : > { %s3931_s25 = sld [smem:[#allocation31_spill]]  ;;  %s2932_s26 = scalar_lea.hbm %s3886_s11, 16 }
  0x4f   : > { %p2933_p2 = scmp.ne.s32.totalorder %s3886_s11, %s2932_s26  ;;  %p2939_p7 = scmp.lt.u32.totalorder %s2932_s26, %s3886_s11 }
  0x51   : > { %p2935_p3 = pnand %p2933_p2, %p3369_p0 }
  0x53   : > { %p2936_p4 = pneg %p2935_p3 }
  0x54   : > { %s473_s20 = sshll.u32 %s3931_s25, 4  ;;  %s474_s20 = int_to_ptr.vmem [resolvable:$true] %s473_s20 }
  0x55   : > { %p2941_p8 = pnand %p2939_p7, %p2936_p4 }
  0x57   : > { %2944 = shalt.err (!%p2941_p8)
}
  0x58   : > { %s2945_s21 = scalar_lea.vmem %s550_s29, 16  ;;  %s2952_s2 = scalar_lea.vmem %s550_s29, 32 }
  0x59   : > { %p2946_p11 = scmp.ne.s32.totalorder %s550_s29, %s2945_s21  ;;  %p2953_p6 = scmp.lt.s32.totalorder %s550_s29, %s550_s29 }
  0x5a   : > { %p2954_p9 = scmp.lt.s32.totalorder %s2952_s2, %s2945_s21 }
  0x5b   : > { %p2948_p13 = pnand %p2946_p11, %p3369_p0 }
  0x5c   : > { %p2955_p5 = por %p2954_p9, %p2953_p6 }
  0x5d   : > { %p2949_p1 = pneg %p2948_p13 }
  0x5f   : > { %p2956_p10 = pnand %p2955_p5, %p2949_p1 }
  0x61   : > { %2959 = shalt.err (!%p2956_p10)
}
  0x62   : > { %2732 = dma.hbm_to_vmem [thread:$0]  (!%p3353_p12), %s3886_s11, 16, %s550_s29, [#allocation14]  }
  0x63   : > { %s2960_s25 = scalar_lea.vmem %s474_s20, 16  ;;  %p2968_p7 = scmp.lt.s32.totalorder %s474_s20, %s474_s20 }
  0x64   : > { %p2961_p2 = scmp.ne.s32.totalorder %s474_s20, %s2960_s25  ;;  %p2969_p8 = scmp.lt.s32.totalorder %s2960_s25, %s2960_s25 }
  0x66   : > { %p2963_p3 = pnand %p2961_p2, %p3369_p0  ;;  %p2970_p11 = por %p2969_p8, %p2968_p7 }
  0x68   : > { %p2964_p4 = pneg %p2963_p3 }
  0x6a   : > { %p2971_p13 = pnand %p2970_p11, %p2964_p4 }
  0x6c   : > { %2974 = shalt.err (!%p2971_p13)
}
  0x6d   : > { %s3176_s22 = smov [#allocation2]   ;;  %s3177_s27 = smov [#allocation6]  }
  0x6e   : > { %2714 = dma.vmem_to_smem (!%p3353_p12), %s474_s20, 16, %s3176_s22, [#allocation5]  }
  0x6f   : > { %s487_s26 = sshll.u32 %s3177_s27, 4  ;;  %s3178_s17 = smov [#allocation9]   ;;  %s488_s26 = int_to_ptr.vmem [resolvable:$true] %s487_s26 }
  0x70   : > { %s511_s29 = sshll.u32 %s3178_s17, 4  ;;  %s2975_s21 = scalar_lea.hbm %s3880_s5, 16  ;;  %s3443_s29 = int_to_ptr.vmem [resolvable:$true] %s511_s29 }
  0x71   : > { %p2976_p5 = scmp.ne.s32.totalorder %s3880_s5, %s2975_s21  ;;  %p2982_p6 = scmp.lt.u32.totalorder %s2975_s21, %s3880_s5 }
  0x73   : > { %p2978_p10 = pnand %p2976_p5, %p3369_p0 }
  0x75   : > { %p2979_p1 = pneg %p2978_p10 }
  0x77   : > { %p2984_p9 = pnand %p2982_p6, %p2979_p1 }
  0x79   : > { %2987 = shalt.err (!%p2984_p9)
}
  0x7a   : > { %s2988_s25 = scalar_lea.vmem %s488_s26, 16  ;;  %s2995_s22 = scalar_lea.vmem %s488_s26, 32 }
  0x7b   : > { %p2989_p2 = scmp.ne.s32.totalorder %s488_s26, %s2988_s25  ;;  %p2996_p7 = scmp.lt.s32.totalorder %s488_s26, %s488_s26 }
  0x7c   : > { %p2997_p8 = scmp.lt.s32.totalorder %s2995_s22, %s2988_s25 }
  0x7d   : > { %p2991_p3 = pnand %p2989_p2, %p3369_p0 }
  0x7e   : > { %p2998_p11 = por %p2997_p8, %p2996_p7 }
  0x7f   : > { %p2992_p4 = pneg %p2991_p3 }
  0x81   : > { %p2999_p13 = pnand %p2998_p11, %p2992_p4 }
  0x83   : > { %3002 = shalt.err (!%p2999_p13)
}
  0x84   : > { %2717 = dma.hbm_to_vmem [thread:$0]  (!%p3353_p12), %s3880_s5, 16, %s488_s26, [#allocation3]  }
  0x85   : > { %s3003_s21 = scalar_lea.hbm %s3882_s7, 16 }
  0x86   : > { %p3004_p5 = scmp.ne.s32.totalorder %s3882_s7, %s3003_s21  ;;  %p3010_p6 = scmp.lt.u32.totalorder %s3003_s21, %s3882_s7 }
  0x88   : > { %p3006_p10 = pnand %p3004_p5, %p3369_p0 }
  0x8a   : > { %p3007_p1 = pneg %p3006_p10 }
  0x8c   : > { %p3012_p9 = pnand %p3010_p6, %p3007_p1 }
  0x8e   : > { %3015 = shalt.err (!%p3012_p9)
}
  0x8f   : > { %s3016_s26 = scalar_lea.vmem %s3443_s29, 16  ;;  %s3023_s25 = scalar_lea.vmem %s3443_s29, 32 }
  0x90   : > { %p3017_p2 = scmp.ne.s32.totalorder %s3443_s29, %s3016_s26  ;;  %p3024_p7 = scmp.lt.s32.totalorder %s3443_s29, %s3443_s29 }
  0x91   : > { %p3025_p8 = scmp.lt.s32.totalorder %s3023_s25, %s3016_s26 }
  0x92   : > { %p3019_p3 = pnand %p3017_p2, %p3369_p0 }
  0x93   : > { %p3026_p11 = por %p3025_p8, %p3024_p7 }
  0x94   : > { %p3020_p4 = pneg %p3019_p3 }
  0x96   : > { %p3027_p13 = pnand %p3026_p11, %p3020_p4 }
  0x98   : > { %3030 = shalt.err (!%p3027_p13)
}
  0x99   : > { %2723 = dma.hbm_to_vmem [thread:$0]  (!%p3353_p12), %s3882_s7, 16, %s3443_s29, [#allocation8]  }
  0x9a   : > { %s3179_s17 = smov [#allocation12]   ;;  %s3180_s28 = smov [#allocation15]  }
  0x9b   : > { %s535_s15 = sshll.u32 %s3179_s17, 4  ;;  %s565_s21 = sshll.u32 %s3180_s28, 4  ;;  %s536_s15 = int_to_ptr.vmem [resolvable:$true] %s535_s15  ;;  %s3487_s21 = int_to_ptr.vmem [resolvable:$true] %s565_s21 }
  0x9c   : > { %s3031_s23 = scalar_lea.hbm %s3885_s10, 256 }
  0x9d   : > { %p3032_p5 = scmp.ne.s32.totalorder %s3885_s10, %s3031_s23  ;;  %p3038_p6 = scmp.lt.u32.totalorder %s3031_s23, %s3885_s10 }
  0x9f   : > { %p3034_p10 = pnand %p3032_p5, %p3369_p0 }
  0xa1   : > { %p3035_p1 = pneg %p3034_p10 }
  0xa3   : > { %p3040_p9 = pnand %p3038_p6, %p3035_p1 }
  0xa5   : > { %3043 = shalt.err (!%p3040_p9)
}
  0xa6   : > { %s3044_s22 = scalar_lea.vmem %s536_s15, 256  ;;  %p3052_p7 = scmp.lt.s32.totalorder %s536_s15, %s536_s15 }
  0xa7   : > { %p3045_p2 = scmp.ne.s32.totalorder %s536_s15, %s3044_s22  ;;  %p3053_p8 = scmp.lt.s32.totalorder %s3044_s22, %s3044_s22 }
  0xa9   : > { %p3047_p3 = pnand %p3045_p2, %p3369_p0  ;;  %p3054_p11 = por %p3053_p8, %p3052_p7 }
  0xab   : > { %p3048_p4 = pneg %p3047_p3 }
  0xad   : > { %p3055_p13 = pnand %p3054_p11, %p3048_p4 }
  0xaf   : > { %3058 = shalt.err (!%p3055_p13)
}
  0xb0   : > { %s3932_s27 = smov 64   ;;  %s3059_s23 = scalar_lea.hbm %s3889_s14, 256 }
  0xb1   : > { %2729 = dma.hbm_to_vmem [thread:$0]  (!%p3353_p12), %s3885_s10, 256, %s536_s15, [#allocation11], %s3932_s27, %s3932_s27, %s3175_s1  }
  0xb2   : > { %p3060_p5 = scmp.ne.s32.totalorder %s3889_s14, %s3059_s23  ;;  %p3066_p6 = scmp.lt.u32.totalorder %s3059_s23, %s3889_s14 }
  0xb4   : > { %p3062_p10 = pnand %p3060_p5, %p3369_p0 }
  0xb6   : > { %p3063_p1 = pneg %p3062_p10 }
  0xb8   : > { %p3068_p9 = pnand %p3066_p6, %p3063_p1 }
  0xba   : > { %3071 = shalt.err (!%p3068_p9)
}
  0xbb   : > { %s3072_s15 = scalar_lea.vmem %s3487_s21, 256  ;;  %p3080_p7 = scmp.lt.s32.totalorder %s3487_s21, %s3487_s21 }
  0xbc   : > { %p3073_p2 = scmp.ne.s32.totalorder %s3487_s21, %s3072_s15  ;;  %p3081_p8 = scmp.lt.s32.totalorder %s3072_s15, %s3072_s15 }
  0xbe   : > { %p3075_p3 = pnand %p3073_p2, %p3369_p0  ;;  %p3082_p11 = por %p3081_p8, %p3080_p7 }
  0xc0   : > { %p3076_p4 = pneg %p3075_p3 }
  0xc2   : > { %p3083_p13 = pnand %p3082_p11, %p3076_p4 }
  0xc4   : > { %3086 = shalt.err (!%p3083_p13)
}
  0xc5   : > { %2735 = dma.hbm_to_vmem [thread:$0]  (!%p3353_p12), %s3889_s14, 256, %s3487_s21, [#allocation14], %s3932_s27, %s3932_s27, %s3175_s1  }
  0xc6   : > { %p3933_p5 = scmp.ne.s32.totalorder %s3928_s24, 0 }
  0xc7   : > { %p3934_p0 = scmp.eq.s32.totalorder (!%p3933_p5), %s3315_s0, 0 }
  0xc8   : > { %610 = sbr.rel (%p3933_p5) target bundleno = 4606 (0x11fe), region = 92 }
  0xcf   : > { %3132 = dma.done.wait (%p3934_p0), [#allocation5], 16   ;;  %p3935_p10 = pmov %p3934_p0 }
  0xd0   : > { %p3936_p1 = pmov %p3934_p0 }
  0xd1   : > { %3134 = vsyncadd (%p3935_p10), [#allocation5], 4294967280 }
  0xd2   : > { %3136 = dma.done.wait (%p3936_p1), [#allocation3], 16   ;;  %p3937_p6 = pmov %p3934_p0 }
  0xd3   : > { %p3938_p9 = pmov %p3934_p0 }
  0xd4   : > { %3138 = vsyncadd (%p3937_p6), [#allocation3], 4294967280 }
  0xd5   : > { %3140 = dma.done.wait (%p3938_p9), [#allocation8], 272   ;;  %p3939_p12 = pmov %p3934_p0 }
  0xd6   : > { %p3940_p2 = pmov %p3934_p0 }
  0xd7   : > { %3142 = vsyncadd (%p3939_p12), [#allocation8], 4294967024 }
  0xd8   : > { %3144 = dma.done.wait (%p3940_p2), [#allocation11], 272   ;;  %p3941_p3 = pmov %p3934_p0 }
  0xd9   : > { %p3942_p4 = pmov %p3934_p0 }
  0xda   : > { %3146 = vsyncadd (%p3941_p3), [#allocation11], 4294967024 }
  0xdb   : > { %3148 = dma.done.wait (%p3942_p4), [#allocation14], 272   ;;  %p3943_p7 = pmov %p3934_p0 }
  0xdd   : > { %3150 = vsyncadd (%p3943_p7), [#allocation14], 4294967024 }
  0xde   : > { %644 = sfence }
  0xdf   : > { %p699_p8 = scmp.lt.s32.totalorder %s3315_s0, 1  ;;  %vm731_vm0 = vcmask 261120   ;;  %s3944_s21 = sld [smem:[#allocation32_spill]]  ;;  %v2816_v7 = vld [vmem:[%s3879_s4] sm:$0xff]   ;;  %v3181_v8 = vmov 0.0   ;;  %vm3182_vm1 = vmmov 0   ;;  %v714_v43 = vlaneseq }
  0xe0   : > { %2521 = vmatprep.subr.bf16.mxu1 %v3181_v8  ;;  %2525 = vmatprep.mubr.msk.bf16.mxu1 %vm3182_vm1, %v3181_v8  ;;  %v2817_v9 = vld [vmem:[%s3879_s4 + $0x8] sm:$0xff]   ;;  %s725_s20 = sld [smem:[#allocation2]]  ;;  %s2411_s26 = sld [smem:[#allocation2 + $0x1]]  ;;  %v2416_v25 = vld [vmem:[#allocation6] ss:$0 sm:$0xff]  ;;  %vm828_vm4 = vcmask 64512  }
  0xe1   : > { %s3560_s18 = scalar_select %p699_p8, %s3315_s0, 1  ;;  %2522 = vmatpush3.bf16.msra.mxu1 %v2816_v7  ;;  %2535 = vmatprep.subr.bf16.mxu0 %v3181_v8  ;;  %v3628_v44 = vshrl.u32 %v714_v43, 7  ;;  %v717_v45 = vand.u32 127, %v714_v43  ;;  %v3190_v46 = vmov -1e+09   ;;  %vm892_vm6 = vcmask 1043456  }
  0xe2   : > { %2523 = vmatprep.subr.bf16.mxu1 %v3181_v8  ;;  %2537 = vmatprep.mubr.msk.bf16.mxu0 %vm3182_vm1, %v3181_v8  ;;  %s3183_s25 = smov 120   ;;  %s3184_s29 = smov 96   ;;  %vm1279_vm7 = vcmask 130048   ;;  %vm1281_vm8 = vcmask 195584   ;;  %vm2167_vm14 = vcmask 523264  }
  0xe3   : > { %s2409_s24 = sshll.u32 %s3560_s18, 3  ;;  %s3185_s15 = smov 88   ;;  %vm718_vm5 = vcmp.ge.s32.totalorder %v3628_v44, %v717_v45 }
  0xe4   : > { %s3186_s22 = smov 80   ;;  %s3187_s17 = smov 112   ;;  %v719_v47 = vsel %vm718_vm5, 0.0, %v3190_v46 }
  0xe5   : > { %s702_s27 = scalar_lea.vmem %s3944_s21, %s2409_s24  ;;  %2524 = vmatpush3.bf16.msra.mxu1 %v2817_v9  ;;  %s3188_s19 = smov 72  }
  0xe6   : > { %v3568_v0 = vld [vmem:[%s702_s27] sm:$0xff]  ;;  %2529 = vmatprep.subr.bf16.mxu1 %v3181_v8  ;;  %v752_v18 = vstv %s725_s20  ;;  %v755_v21 = vstv %s2411_s26  ;;  %s3189_s1 = smov 104   ;;  %s3191_s21 = smov 64  }
  0xe7   : > { %v732_v1 = vsel %vm731_vm0, %v3568_v0, 0.0  ;;  %s3192_s27 = smov 56   ;;  %s3193_s28 = smov 48  }
  0xe8   : > { %733 = vadd.xlane.f32.xlu0 %v732_v1  ;;  %s3194_s2 = smov 40   ;;  %s3911_s30 = smov 8  }
  0xe9   : > { %s3910_s23 = smov 16   ;;  %s3909_s20 = smov 24  }
 0x175   : > { %v734_v2 = vpop.xlane.xlu0 %733 }
 0x176   : > { %v736_v3 = vmul.f32 0.03125, %v734_v2 }
 0x178   : > { %v737_v4 = vsub.f32 %v3568_v0, %v736_v3 }
 0x17a   : > { %v738_v5 = vmul.f32 %v737_v4, %v737_v4 }
 0x17c   : > { %v739_v6 = vsel %vm731_vm0, %v738_v5, 0.0 }
 0x17d   : > { %740 = vadd.xlane.f32.xlu0 %v739_v6 }
 0x20a   : > { %v741_v10 = vpop.xlane.xlu0 %740 }
 0x20b   : > { %v742_v11 = vmul.f32 0.032258064, %v741_v10 }
 0x20d   : > { %2832 = vrsqrt.f32 %v742_v11  ;;  %vm745_vm2 = vcmp.eq.f32.partialorder %v742_v11, inf  ;;  %v748_v14 = vand.u32 2147483648, %v742_v11  ;;  %vm747_vm3 = vcmp.eq.f32.partialorder %v742_v11, 0.0 }
 0x217   : > { %v2833_v12 = vpop.eup %2832 }
 0x218   : > { %v744_v13 = vmul.f32 %v2833_v12, %v742_v11 }
 0x21a   : > { %v746_v15 = vsel %vm745_vm2, %v742_v11, %v744_v13 }
 0x21b   : > { %v749_v16 = vsel %vm747_vm3, %v748_v14, %v746_v15 }
 0x21c   : > { %v750_v17 = vadd.f32 1e-06, %v749_v16 }
 0x21e   : > { %2834 = vrcp.f32 %v750_v17 }
 0x228   : > { %v2835_v19 = vpop.eup %2834 }
 0x229   : > { %v753_v20 = vmul.f32 %v2835_v19, %v752_v18 }
 0x22b   : > { %v754_v22 = vmul.f32 %v753_v20, %v737_v4 }
 0x22d   : > { %v756_v23 = vadd.f32 %v755_v21, %v754_v22 }
 0x22f   : > { %v757_v24 = vpack.c.bf16 %v756_v23, %v756_v23 }
 0x231   : > { %2526 = vmatmul.mubr.msk.bf16.vlgmr.msra.gmra.mrb[0].mxu1 %vm731_vm0, %v757_v24 }
 0x232   : > { %2531 = vmatprep.mubr.msk.bf16.mxu1 %vm3182_vm1, %v3181_v8 }
 0x304   : > { %v818_v26 = vpop.f32.mrb[0].mxu1 }
 0x305   : > { %v819_v27 = vadd.f32 %v2416_v25, %v818_v26  ;;  %v2527_v28 = vpop.f32.mrb[1].mxu1 }
 0x306   : > { %v821_v29 = vpop.f32.mrb[2].mxu1 }
 0x307   : > { %v3591_v30 = vpack.c.bf16 %v819_v27, %v819_v27  ;;  %v2528_v31 = vpop.f32.mrb[3].mxu1 }
 0x309   : > { %936 = vrot.lane.b32.xlu0 %v3591_v30, %s3183_s25  ;;  %826 = vrot.lane.b32.xlu1 %v3591_v30, %s3184_s29 }
 0x30d   : > { %938 = vrot.lane.b32.xlu1 %v3591_v30, %s3185_s15 }
 0x311   : > { %1048 = vrot.lane.b32.xlu1 %v3591_v30, %s3186_s22 }
 0x315   : > { %1046 = vrot.lane.b32.xlu1 %v3591_v30, %s3187_s17 }
 0x319   : > { %1158 = vrot.lane.b32.xlu1 %v3591_v30, %s3188_s19 }
 0x31d   : > { %1156 = vrot.lane.b32.xlu1 %v3591_v30, %s3189_s1 }
 0x37b   : > { %v827_v32 = vpop.permute.xlu1 %826  ;;  %v937_v37 = vpop.permute.xlu0 %936 }
 0x37c   : > { %v833_v33 = vsel %vm828_vm4, %v827_v32, 0 }
 0x37d   : > { %2530 = vmatpush3.bf16.xpose.msra.mxu1 %v833_v33 }
 0x37e   : > { %2541 = vmatprep.subr.bf16.mxu1 %v3181_v8 }
 0x37f   : > { %v939_v34 = vpop.permute.xlu1 %938 }
 0x380   : > { %v944_v35 = vsel %vm828_vm4, %v939_v34, 0 }
 0x383   : > { %v1049_v36 = vpop.permute.xlu1 %1048 }
 0x384   : > { %2532 = vmatmul.mubr.msk.bf16.vlgmr.msra.gmra.mrb[4].mxu1 %vm828_vm4, %v3591_v30  ;;  %v1054_v39 = vsel %vm828_vm4, %v1049_v36, 0 }
 0x385   : > { %2542 = vmatpush3.bf16.xpose.msra.mxu1 %v944_v35  ;;  %2543 = vmatprep.mubr.msk.bf16.mxu1 %vm3182_vm1, %v3181_v8 }
 0x386   : > { %2553 = vmatprep.subr.bf16.mxu1 %v3181_v8 }
 0x387   : > { %v1047_v38 = vpop.permute.xlu1 %1046 }
 0x38b   : > { %v1159_v40 = vpop.permute.xlu1 %1158 }
 0x38c   : > { %2544 = vmatmul.mubr.msk.bf16.vlgmr.msra.gmra.mrb[8].mxu1 %vm828_vm4, %v937_v37  ;;  %v1164_v41 = vsel %vm828_vm4, %v1159_v40, 0 }
 0x38d   : > { %2554 = vmatpush3.bf16.xpose.msra.mxu1 %v1054_v39  ;;  %2555 = vmatprep.mubr.msk.bf16.mxu1 %vm3182_vm1, %v3181_v8 }
 0x38e   : > { %2565 = vmatprep.subr.bf16.mxu1 %v3181_v8 }
 0x38f   : > { %v1157_v42 = vpop.permute.xlu1 %1156 }
 0x394   : > { %2556 = vmatmul.mubr.msk.bf16.vlgmr.msra.gmra.mrb[12].mxu1 %vm828_vm4, %v1047_v38 }
 0x395   : > { %2566 = vmatpush3.bf16.xpose.msra.mxu1 %v1164_v41  ;;  %2567 = vmatprep.mubr.msk.bf16.mxu1 %vm3182_vm1, %v3181_v8 }
 0x396   : > { %2577 = vmatprep.subr.bf16.mxu1 %v3181_v8 }
 0x39c   : > { %2568 = vmatmul.mubr.msk.bf16.vlgmr.msra.gmra.mrb[16].mxu1 %vm828_vm4, %v1157_v42 }
 0x39d   : > { %2581 = vmatprep.mubr.msk.bf16.mxu1 %vm3182_vm1, %v3181_v8 }
 0x457   : > { %v869_v48 = vpop.f32.mrb[4].mxu1 }
 0x458   : > { %v870_v49 = vadd.f32 %v869_v48, %v719_v47  ;;  %v2533_v50 = vpop.f32.mrb[5].mxu1 }
 0x459   : > { %v872_v51 = vpop.f32.mrb[6].mxu1 }
 0x45a   : > { %v2534_v52 = vpop.f32.mrb[7].mxu1  ;;  %v875_v53 = vsel %vm828_vm4, %v870_v49, -inf }
 0x45b   : > { %876 = vmax.xlane.f32.xlu1 %v875_v53 }
 0x45f   : > { %v980_v54 = vpop.f32.mrb[8].mxu1 }
 0x460   : > { %v981_v55 = vadd.f32 %v980_v54, %v719_v47  ;;  %v2545_v56 = vpop.f32.mrb[9].mxu1 }
 0x461   : > { %v983_v57 = vpop.f32.mrb[10].mxu1 }
 0x462   : > { %v2546_v58 = vpop.f32.mrb[11].mxu1  ;;  %v986_v59 = vsel %vm828_vm4, %v981_v55, -inf }
 0x463   : > { %987 = vmax.xlane.f32.xlu0 %v986_v59 }
 0x467   : > { %v1090_v60 = vpop.f32.mrb[12].mxu1 }
 0x468   : > { %v1091_v61 = vadd.f32 %v1090_v60, %v719_v47  ;;  %v2557_v62 = vpop.f32.mrb[13].mxu1 }
 0x469   : > { %v1093_v63 = vpop.f32.mrb[14].mxu1 }
 0x46a   : > { %v2558_v1 = vpop.f32.mrb[15].mxu1  ;;  %v1096_v2 = vsel %vm828_vm4, %v1091_v61, -inf  ;;  %v2818_v63 = vld [vmem:[#allocation7] sm:$0xff]  }
 0x46b   : > { %1097 = vmax.xlane.f32.xlu1 %v1096_v2  ;;  %2578 = vmatpush3.bf16.msra.mxu1 %v2818_v63  ;;  %v2819_v1 = vld [vmem:[#allocation7 + $0x8] sm:$0xff]  }
 0x46c   : > { %2579 = vmatprep.subr.bf16.mxu1 %v3181_v8 }
 0x46f   : > { %v1200_v3 = vpop.f32.mrb[16].mxu1  ;;  %2580 = vmatpush3.bf16.msra.mxu1 %v2819_v1 }
 0x470   : > { %v1201_v4 = vadd.f32 %v1200_v3, %v719_v47  ;;  %v2569_v5 = vpop.f32.mrb[17].mxu1  ;;  %2593 = vmatprep.subr.bf16.mxu1 %v3181_v8 }
 0x471   : > { %v1203_v6 = vpop.f32.mrb[18].mxu1 }
 0x472   : > { %v2570_v7 = vpop.f32.mrb[19].mxu1  ;;  %v1206_v9 = vsel %vm828_vm4, %v1201_v4, -inf }
 0x473   : > { %1207 = vmax.xlane.f32.xlu0 %v1206_v9 }
 0x4e8   : > { %v877_v10 = vpop.xlane.xlu1 %876 }
 0x4e9   : > { %v878_v11 = vsub.f32 %v870_v49, %v877_v10 }
 0x4eb   : > { %v879_v12 = vmul.f32 1.442695, %v878_v11 }
 0x4ed   : > { %2836 = vpow2.f32 %v879_v12 }
 0x4f0   : > { %v988_v13 = vpop.xlane.xlu0 %987 }
 0x4f1   : > { %v989_v14 = vsub.f32 %v981_v55, %v988_v13 }
 0x4f3   : > { %v990_v15 = vmul.f32 1.442695, %v989_v14 }
 0x4f5   : > { %2838 = vpow2.f32 %v990_v15 }
 0x4f7   : > { %v2837_v16 = vpop.eup %2836 }
 0x4f8   : > { %v881_v17 = vsel %vm828_vm4, %v2837_v16, 0.0  ;;  %v1098_v25 = vpop.xlane.xlu1 %1097 }
 0x4f9   : > { %882 = vadd.xlane.f32.xlu1 %v881_v17  ;;  %v1099_v26 = vsub.f32 %v1091_v61, %v1098_v25 }
 0x4fb   : > { %v1100_v27 = vmul.f32 1.442695, %v1099_v26 }
 0x4ff   : > { %v2839_v18 = vpop.eup %2838 }
 0x500   : > { %v1208_v19 = vpop.xlane.xlu0 %1207  ;;  %v992_v20 = vsel %vm828_vm4, %v2839_v18, 0.0 }
 0x501   : > { %v1209_v21 = vsub.f32 %v1201_v4, %v1208_v19  ;;  %993 = vadd.xlane.f32.xlu0 %v992_v20 }
 0x503   : > { %v1210_v22 = vmul.f32 1.442695, %v1209_v21 }
 0x505   : > { %2840 = vpow2.f32 %v1210_v22 }
 0x506   : > { %2842 = vpow2.f32 %v1100_v27 }
 0x50a   : > { %887 = vrot.lane.b32.xlu1 %v3591_v30, %s3191_s21 }
 0x50f   : > { %v2841_v23 = vpop.eup %2840 }
 0x510   : > { %v1212_v24 = vsel %vm828_vm4, %v2841_v23, 0.0  ;;  %v2843_v28 = vpop.eup %2842 }
 0x511   : > { %1213 = vadd.xlane.f32.xlu0 %v1212_v24  ;;  %v1102_v29 = vsel %vm828_vm4, %v2843_v28, 0.0 }
 0x527   : > { %998 = vrot.lane.b32.xlu0 %v3591_v30, %s3192_s27  ;;  %s3945_s27 = sld [smem:[#allocation33_spill]] }
 0x52e   : > { %1103 = vadd.xlane.f32.xlu1 %v1102_v29 }
 0x53f   : > { %1108 = vrot.lane.b32.xlu1 %v3591_v30, %s3193_s28  ;;  %s706_s28 = scalar_lea.vmem %s3945_s27, %s2409_s24  ;;  %s2412_s24 = sld [smem:[#allocation2 + $0x2]] }
 0x543   : > { %1218 = vrot.lane.b32.xlu1 %v3591_v30, %s3194_s2  ;;  %s3952_s2 = sld [smem:[#allocation29_spill]] }
 0x549   : > { %p3955_p13 = scmp.ne.s32.totalorder %s3952_s2, 0 }
 0x586   : > { %v883_v31 = vpop.xlane.xlu1 %882 }
 0x587   : > { %2844 = vrcp.f32 %v883_v31 }
 0x58a   : > { %v888_v32 = vpop.permute.xlu1 %887 }
 0x58b   : > { %v894_v33 = vsel %vm892_vm6, %v888_v32, 0  ;;  %v2822_v32 = vld [vmem:[%s3883_s8] sm:$0xff]  }
 0x58c   : > { %2536 = vmatpush3.bf16.msra.mxu0 %v894_v33  ;;  %v712_v33 = vld [vmem:[%s706_s28] sm:$0xff]  ;;  %s3951_s28 = sld [smem:[#allocation35_spill]] }
 0x58d   : > { %2547 = vmatprep.subr.bf16.mxu0 %v3181_v8 }
 0x58e   : > { %v994_v35 = vpop.xlane.xlu0 %993 }
 0x58f   : > { %2846 = vrcp.f32 %v994_v35  ;;  %v2823_v35 = vld [vmem:[%s3883_s8 + $0x8] sm:$0xff]  }
 0x591   : > { %v2845_v34 = vpop.eup %2844 }
 0x592   : > { %v885_v36 = vmul.f32 %v2845_v34, %v2837_v16  ;;  %v2821_v34 = vld [vmem:[#allocation12 + $0x8] sm:$0xff]  }
 0x594   : > { %v886_v37 = vpack.c.bf16 %v885_v36, %v885_v36  ;;  %v713_v36 = vpack.c.bf16 %v712_v33, %v712_v33 }
 0x596   : > { %2538 = vmatmul.mubr.msk.bf16.vlgmr.msra.gmra.mrb[0].mxu0 %vm828_vm4, %v886_v37 }
 0x597   : > { %2549 = vmatprep.mubr.msk.bf16.mxu0 %vm3182_vm1, %v3181_v8 }
 0x599   : > { %v2847_v30 = vpop.eup %2846 }
 0x59a   : > { %v996_v39 = vmul.f32 %v2847_v30, %v2839_v18  ;;  %v2428_v18 = vld [vmem:[#allocation9] ss:$0 sm:$0xff] }
 0x59c   : > { %v997_v42 = vpack.c.bf16 %v996_v39, %v996_v39 }
 0x59e   : > { %v1214_v38 = vpop.xlane.xlu0 %1213 }
 0x5a2   : > { %v999_v40 = vpop.permute.xlu0 %998 }
 0x5a3   : > { %v1004_v41 = vsel %vm892_vm6, %v999_v40, 0 }
 0x5a4   : > { %2548 = vmatpush3.bf16.msra.mxu0 %v1004_v41 }
 0x5a5   : > { %2559 = vmatprep.subr.bf16.mxu0 %v3181_v8 }
 0x5a7   : > { %2550 = vmatmul.mubr.msk.bf16.vlgmr.msra.gmra.mrb[4].mxu0 %vm828_vm4, %v997_v42 }
 0x5a8   : > { %2561 = vmatprep.mubr.msk.bf16.mxu0 %vm3182_vm1, %v3181_v8 }
 0x5bb   : > { %v1104_v43 = vpop.xlane.xlu1 %1103 }
 0x5bc   : > { %2848 = vrcp.f32 %v1104_v43 }
 0x5bd   : > { %2850 = vrcp.f32 %v1214_v38 }
 0x5bf   : > { %v1109_v45 = vpop.permute.xlu1 %1108 }
 0x5c0   : > { %v1114_v46 = vsel %vm892_vm6, %v1109_v45, 0  ;;  %v1370_v45 = vstv %s2412_s24  ;;  %s2463_s24 = sshll.u32 %s3315_s0, 7 }
 0x5c1   : > { %2560 = vmatpush3.bf16.msra.mxu0 %v1114_v46 }
 0x5c2   : > { %2571 = vmatprep.subr.bf16.mxu0 %v3181_v8 }
 0x5c3   : > { %v1219_v49 = vpop.permute.xlu1 %1218 }
 0x5c4   : > { %v1224_v52 = vsel %vm892_vm6, %v1219_v49, 0 }
 0x5c6   : > { %v2849_v47 = vpop.eup %2848 }
 0x5c7   : > { %v1106_v48 = vmul.f32 %v2849_v47, %v2843_v28  ;;  %v2851_v51 = vpop.eup %2850 }
 0x5c8   : > { %v1216_v53 = vmul.f32 %v2851_v51, %v2841_v23 }
 0x5c9   : > { %v1107_v50 = vpack.c.bf16 %v1106_v48, %v1106_v48 }
 0x5ca   : > { %v1217_v54 = vpack.c.bf16 %v1216_v53, %v1216_v53 }
 0x5cb   : > { %2562 = vmatmul.mubr.msk.bf16.vlgmr.msra.gmra.mrb[8].mxu0 %vm828_vm4, %v1107_v50 }
 0x5cc   : > { %2572 = vmatpush3.bf16.msra.mxu0 %v1224_v52  ;;  %2573 = vmatprep.mubr.msk.bf16.mxu0 %vm3182_vm1, %v3181_v8  ;;  %v2436_v52 = vld [vmem:[#allocation13] ss:$0 sm:$0xff] }
 0x5cd   : > { %2585 = vmatprep.subr.bf16.mxu0 %v3181_v8 }
 0x5d3   : > { %2574 = vmatmul.mubr.msk.bf16.vlgmr.msra.gmra.mrb[12].mxu0 %vm828_vm4, %v1217_v54 }
 0x5d4   : > { %2589 = vmatprep.mubr.msk.bf16.mxu0 %vm3182_vm1, %v3181_v8  ;;  %2586 = vmatpush3.bf16.msra.mxu0 %v2822_v32 }
 0x5d5   : > { %2587 = vmatprep.subr.bf16.mxu0 %v3181_v8 }
 0x5d8   : > { %2588 = vmatpush3.bf16.msra.mxu0 %v2823_v35 }
 0x5d9   : > { %2601 = vmatprep.subr.bf16.mxu0 %v3181_v8 }
 0x669   : > { %v930_v55 = vpop.f32.mrb[0].mxu0 }
 0x66a   : > { %v2539_v56 = vpop.f32.mrb[1].mxu0 }
 0x66b   : > { %v933_v57 = vpop.f32.mrb[2].mxu0 }
 0x66c   : > { %v2540_v58 = vpop.f32.mrb[3].mxu0 }
 0x67a   : > { %v1040_v59 = vpop.f32.mrb[4].mxu0 }
 0x67b   : > { %1267 = vrot.lane.b32.xlu0 %v1040_v59, %s3911_s30  ;;  %v2551_v60 = vpop.f32.mrb[5].mxu0  ;;  %s2413_s30 = sld [smem:[#allocation2 + $0x3]] }
 0x67c   : > { %v1043_v61 = vpop.f32.mrb[6].mxu0  ;;  %v2432_v60 = vld [vmem:[#allocation10] ss:$0 sm:$0xff] }
 0x67d   : > { %v2552_v62 = vpop.f32.mrb[7].mxu0 }
 0x681   : > { %v1373_v48 = vstv %s2413_s30  ;;  %s2414_s30 = sld [smem:[#allocation2 + $0x4]] }
 0x69e   : > { %v1150_v2 = vpop.f32.mrb[8].mxu0 }
 0x69f   : > { %1271 = vrot.lane.b32.xlu1 %v1150_v2, %s3910_s23  ;;  %v2563_v3 = vpop.f32.mrb[9].mxu0  ;;  %s3947_s23 = smov 16  }
 0x6a0   : > { %v1153_v4 = vpop.f32.mrb[10].mxu0 }
 0x6a1   : > { %v2564_v5 = vpop.f32.mrb[11].mxu0 }
 0x6a6   : > { %v1260_v6 = vpop.f32.mrb[12].mxu0 }
 0x6a7   : > { %1275 = vrot.lane.b32.xlu0 %v1260_v6, %s3909_s20  ;;  %v2575_v7 = vpop.f32.mrb[13].mxu0  ;;  %s3948_s20 = smov 24  }
 0x6a8   : > { %v1263_v9 = vpop.f32.mrb[14].mxu0 }
 0x6a9   : > { %v2576_v10 = vpop.f32.mrb[15].mxu0 }
 0x6ed   : > { %v1268_v11 = vpop.permute.xlu0 %1267 }
 0x6ee   : > { %v1278_v13 = vsel %vm828_vm4, %v930_v55, %v1268_v11 }
 0x711   : > { %v1272_v12 = vpop.permute.xlu1 %1271 }
 0x712   : > { %v1280_v14 = vsel %vm1279_vm7, %v1278_v13, %v1272_v12 }
 0x719   : > { %v1276_v15 = vpop.permute.xlu0 %1275 }
 0x71a   : > { %v1282_v16 = vsel %vm1281_vm8, %v1280_v14, %v1276_v15 }
 0x71b   : > { %v1283_v17 = vpack.c.bf16 %v1282_v16, %v1282_v16 }
 0x71d   : > { %2582 = vmatmul.mubr.msk.bf16.vlgmr.msra.gmra.mrb[20].mxu1 %vm731_vm0, %v1283_v17  ;;  %v1512_v17 = vsub.s32 0, %v3628_v44 }
 0x71e   : > { %2597 = vmatprep.mubr.msk.bf16.mxu1 %vm3182_vm1, %v3181_v8 }
 0x7f0   : > { %v1344_v19 = vpop.f32.mrb[20].mxu1 }
 0x7f1   : > { %v1345_v20 = vadd.f32 %v2428_v18, %v1344_v19  ;;  %v2583_v21 = vpop.f32.mrb[21].mxu1 }
 0x7f2   : > { %v1347_v22 = vpop.f32.mrb[22].mxu1 }
 0x7f3   : > { %v3675_v23 = vadd.f32 %v1345_v20, %v3568_v0  ;;  %v2584_v24 = vpop.f32.mrb[23].mxu1  ;;  %v2820_v0 = vld [vmem:[#allocation12] sm:$0xff]  }
 0x7f4   : > { %2594 = vmatpush3.bf16.msra.mxu1 %v2820_v0 }
 0x7f5   : > { %v1351_v25 = vsel %vm731_vm0, %v3675_v23, 0.0  ;;  %2595 = vmatprep.subr.bf16.mxu1 %v3181_v8 }
 0x7f6   : > { %1352 = vadd.xlane.f32.xlu1 %v1351_v25 }
 0x7f8   : > { %2596 = vmatpush3.bf16.msra.mxu1 %v2821_v34 }
 0x7f9   : > { %2607 = vmatprep.subr.bf16.mxu1 %v3181_v8 }
 0x7fb   : > { %2598 = vmatmul.mubr.msk.bf16.vlgmr.msra.gmra.mrb[24].mxu1 %vm731_vm0, %v713_v36 }
 0x7fc   : > { %2609 = vmatprep.mubr.msk.bf16.mxu1 %vm3182_vm1, %v3181_v8 }
 0x883   : > { %v1353_v26 = vpop.xlane.xlu1 %1352 }
 0x884   : > { %v1354_v27 = vmul.f32 0.03125, %v1353_v26 }
 0x886   : > { %v1355_v28 = vsub.f32 %v3675_v23, %v1354_v27 }
 0x888   : > { %v1356_v29 = vmul.f32 %v1355_v28, %v1355_v28 }
 0x88a   : > { %v1357_v31 = vsel %vm731_vm0, %v1356_v29, 0.0 }
 0x88b   : > { %1358 = vadd.xlane.f32.xlu0 %v1357_v31 }
 0x8ce   : > { %v1502_v53 = vpop.f32.mrb[24].mxu1 }
 0x8cf   : > { %v1503_v54 = vadd.f32 %v2436_v52, %v1502_v53  ;;  %v2599_v55 = vpop.f32.mrb[25].mxu1 }
 0x8d0   : > { %v1505_v56 = vpop.f32.mrb[26].mxu1 }
 0x8d1   : > { %v3702_v57 = vpack.c.bf16 %v1503_v54, %v1503_v54  ;;  %v2600_v58 = vpop.f32.mrb[27].mxu1 }
 0x8d3   : > { %1624 = vrot.lane.b32.xlu0 %v3702_v57, %s3183_s25  ;;  %v1518_v59 = vsel %vm828_vm4, %v3702_v57, 0 }
 0x918   : > { %v1359_v37 = vpop.xlane.xlu0 %1358 }
 0x919   : > { %v1360_v30 = vmul.f32 0.032258064, %v1359_v37 }
 0x91b   : > { %2852 = vrsqrt.f32 %v1360_v30  ;;  %vm1363_vm9 = vcmp.eq.f32.partialorder %v1360_v30, inf  ;;  %v1366_v40 = vand.u32 2147483648, %v1360_v30  ;;  %vm1365_vm10 = vcmp.eq.f32.partialorder %v1360_v30, 0.0 }
 0x925   : > { %v2853_v38 = vpop.eup %2852 }
 0x926   : > { %v1362_v39 = vmul.f32 %v2853_v38, %v1360_v30 }
 0x928   : > { %v1364_v41 = vsel %vm1363_vm9, %v1360_v30, %v1362_v39 }
 0x929   : > { %v1367_v42 = vsel %vm1365_vm10, %v1366_v40, %v1364_v41 }
 0x92a   : > { %v1368_v43 = vadd.f32 1e-06, %v1367_v42 }
 0x92c   : > { %2854 = vrcp.f32 %v1368_v43 }
 0x936   : > { %v2855_v46 = vpop.eup %2854 }
 0x937   : > { %v1371_v47 = vmul.f32 %v2855_v46, %v1370_v45 }
 0x939   : > { %v1372_v49 = vmul.f32 %v1371_v47, %v1355_v28 }
 0x93b   : > { %v1374_v50 = vadd.f32 %v1373_v48, %v1372_v49 }
 0x93d   : > { %v1375_v51 = vpack.c.bf16 %v1374_v50, %v1374_v50 }
 0x93f   : > { %2590 = vmatmul.mubr.msk.bf16.vlgmr.msra.gmra.mrb[16].mxu0 %vm731_vm0, %v1375_v51 }
 0x940   : > { %2603 = vmatprep.mubr.msk.bf16.mxu0 %vm3182_vm1, %v3181_v8  ;;  %2602 = vmatpush3.bf16.xpose.msra.mxu0 %v1518_v59 }
 0x941   : > { %2613 = vmatprep.subr.bf16.mxu0 %v3181_v8 }
 0x945   : > { %v1625_v1 = vpop.permute.xlu0 %1624 }
 0x946   : > { %v1630_v5 = vsel %vm828_vm4, %v1625_v1, 0 }
 0xa12   : > { %v1436_v61 = vpop.f32.mrb[16].mxu0 }
 0xa13   : > { %v1437_v62 = vadd.f32 %v2432_v60, %v1436_v61  ;;  %v2591_v63 = vpop.f32.mrb[17].mxu0 }
 0xa14   : > { %v1439_v2 = vpop.f32.mrb[18].mxu0 }
 0xa15   : > { %v1508_v3 = vpack.c.bf16 %v1437_v62, %v1437_v62  ;;  %v2592_v4 = vpop.f32.mrb[19].mxu0 }
 0xa17   : > { %1622 = vrot.lane.b32.xlu1 %v1508_v3, %s3183_s25  ;;  %1732 = vrot.lane.b32.xlu0 %v1508_v3, %s3187_s17  ;;  %s2415_s25 = sld [smem:[#allocation2 + $0x5]] }
 0xa18   : > { %2604 = vmatmul.mubr.msk.bf16.vlgmr.msra.gmra.mrb[20].mxu0 %vm828_vm4, %v1508_v3 }
 0xa19   : > { %2614 = vmatpush3.bf16.xpose.msra.mxu0 %v1630_v5  ;;  %2615 = vmatprep.mubr.msk.bf16.mxu0 %vm3182_vm1, %v3181_v8 }
 0xa1a   : > { %2625 = vmatprep.subr.bf16.mxu0 %v3181_v8 }
 0xa1b   : > { %1734 = vrot.lane.b32.xlu1 %v3702_v57, %s3187_s17  ;;  %1842 = vrot.lane.b32.xlu0 %v1508_v3, %s3189_s1 }
 0xa1f   : > { %1844 = vrot.lane.b32.xlu1 %v3702_v57, %s3189_s1  ;;  %s709_s1 = scalar_lea.vmem %s3878_s3, %s3560_s18  ;;  %s3946_s18 = smov 8  }
 0xa20   : > { %v720_v14 = vld [vmem:[%s709_s1] sm:$0x1] }
 0xa21   : > { %v721_v15 = vunpack.c.0.s8 %v720_v14 }
 0xa23   : > { %v722_v16 = vcvt.s32.f32 %v721_v15 }
 0xa25   : > { %vm723_vm11 = vcmp.eq.f32.partialorder %v722_v16, 0.0 }
 0xa26   : > { %v724_v18 = vsel %vm723_vm11, -1e+09, %v3181_v8 }
 0xa27   : > { %v1513_v19 = vrot.slane %v724_v18, %v1512_v17 }
 0xa89   : > { %v1623_v6 = vpop.permute.xlu1 %1622  ;;  %v1733_v11 = vpop.permute.xlu0 %1732 }
 0xa8a   : > { %2616 = vmatmul.mubr.msk.bf16.vlgmr.msra.gmra.mrb[24].mxu0 %vm828_vm4, %v1623_v6 }
 0xa8b   : > { %2627 = vmatprep.mubr.msk.bf16.mxu0 %vm3182_vm1, %v3181_v8 }
 0xa8d   : > { %v1735_v7 = vpop.permute.xlu1 %1734  ;;  %v1843_v13 = vpop.permute.xlu0 %1842 }
 0xa8e   : > { %v1740_v9 = vsel %vm828_vm4, %v1735_v7, 0 }
 0xa8f   : > { %2626 = vmatpush3.bf16.xpose.msra.mxu0 %v1740_v9 }
 0xa90   : > { %2637 = vmatprep.subr.bf16.mxu0 %v3181_v8 }
 0xa91   : > { %v1845_v10 = vpop.permute.xlu1 %1844 }
 0xa92   : > { %v1850_v12 = vsel %vm828_vm4, %v1845_v10, 0 }
 0xa96   : > { %2628 = vmatmul.mubr.msk.bf16.vlgmr.msra.gmra.mrb[28].mxu0 %vm828_vm4, %v1733_v11 }
 0xa97   : > { %2638 = vmatpush3.bf16.xpose.msra.mxu0 %v1850_v12  ;;  %2639 = vmatprep.mubr.msk.bf16.mxu0 %vm3182_vm1, %v3181_v8 }
 0xa98   : > { %2649 = vmatprep.subr.bf16.mxu0 %v3181_v8 }
 0xa9e   : > { %2640 = vmatmul.mubr.msk.bf16.vlgmr.msra.gmra.mrb[32].mxu0 %vm828_vm4, %v1843_v13 }
 0xa9f   : > { %2653 = vmatprep.mubr.msk.bf16.mxu0 %vm3182_vm1, %v3181_v8 }
 0xaeb   : > { %v1554_v20 = vpop.f32.mrb[20].mxu0 }
 0xaec   : > { %v1555_v21 = vadd.f32 %v1554_v20, %v1513_v19  ;;  %v2605_v22 = vpop.f32.mrb[21].mxu0 }
 0xaed   : > { %v1557_v24 = vpop.f32.mrb[22].mxu0 }
 0xaee   : > { %v2606_v25 = vpop.f32.mrb[23].mxu0  ;;  %v1560_v26 = vsel %vm828_vm4, %v1555_v21, -inf }
 0xaef   : > { %1561 = vmax.xlane.f32.xlu1 %v1560_v26 }
 0xb5d   : > { %v1666_v27 = vpop.f32.mrb[24].mxu0 }
 0xb5e   : > { %v1667_v28 = vadd.f32 %v1666_v27, %v1513_v19  ;;  %v2617_v29 = vpop.f32.mrb[25].mxu0 }
 0xb5f   : > { %v1669_v31 = vpop.f32.mrb[26].mxu0 }
 0xb60   : > { %v2618_v0 = vpop.f32.mrb[27].mxu0  ;;  %v1672_v32 = vsel %vm828_vm4, %v1667_v28, -inf }
 0xb61   : > { %1673 = vmax.xlane.f32.xlu0 %v1672_v32 }
 0xb69   : > { %v1776_v44 = vpop.f32.mrb[28].mxu0 }
 0xb6a   : > { %v1777_v33 = vadd.f32 %v1776_v44, %v1513_v19  ;;  %v2629_v34 = vpop.f32.mrb[29].mxu0 }
 0xb6b   : > { %v1779_v35 = vpop.f32.mrb[30].mxu0  ;;  %v2824_v34 = vld [vmem:[%s3887_s12] sm:$0xff]  }
 0xb6c   : > { %v2630_v36 = vpop.f32.mrb[31].mxu0  ;;  %v1782_v37 = vsel %vm828_vm4, %v1777_v33, -inf  ;;  %2650 = vmatpush3.bf16.msra.mxu0 %v2824_v34  ;;  %v2825_v35 = vld [vmem:[%s3887_s12 + $0x8] sm:$0xff]  }
 0xb6d   : > { %1783 = vmax.xlane.f32.xlu0 %v1782_v37  ;;  %2651 = vmatprep.subr.bf16.mxu0 %v3181_v8 }
 0xb70   : > { %2652 = vmatpush3.bf16.msra.mxu0 %v2825_v35 }
 0xb71   : > { %v1886_v30 = vpop.f32.mrb[32].mxu0  ;;  %2665 = vmatprep.subr.bf16.mxu0 %v3181_v8 }
 0xb72   : > { %v1887_v38 = vadd.f32 %v1886_v30, %v1513_v19  ;;  %v2641_v39 = vpop.f32.mrb[33].mxu0 }
 0xb73   : > { %v1889_v40 = vpop.f32.mrb[34].mxu0 }
 0xb74   : > { %v2642_v41 = vpop.f32.mrb[35].mxu0  ;;  %v1892_v42 = vsel %vm828_vm4, %v1887_v38, -inf }
 0xb75   : > { %1893 = vmax.xlane.f32.xlu1 %v1892_v42 }
 0xb7c   : > { %v1562_v43 = vpop.xlane.xlu1 %1561 }
 0xb7d   : > { %v1563_v45 = vsub.f32 %v1555_v21, %v1562_v43 }
 0xb7f   : > { %v1564_v46 = vmul.f32 1.442695, %v1563_v45 }
 0xb81   : > { %2856 = vpow2.f32 %v1564_v46 }
 0xb8b   : > { %v2857_v47 = vpop.eup %2856 }
 0xb8c   : > { %v1566_v48 = vsel %vm828_vm4, %v2857_v47, 0.0 }
 0xb8d   : > { %1567 = vadd.xlane.f32.xlu0 %v1566_v48 }
 0xbee   : > { %v1674_v49 = vpop.xlane.xlu0 %1673 }
 0xbef   : > { %v1675_v50 = vsub.f32 %v1667_v28, %v1674_v49 }
 0xbf1   : > { %v1676_v51 = vmul.f32 1.442695, %v1675_v50 }
 0xbf3   : > { %2858 = vpow2.f32 %v1676_v51  ;;  %v2448_v51 = vld [vmem:[%s3888_s13] ss:$0 sm:$0xff] }
 0xbfa   : > { %v1784_v52 = vpop.xlane.xlu0 %1783 }
 0xbfb   : > { %v1785_v53 = vsub.f32 %v1777_v33, %v1784_v52 }
 0xbfd   : > { %v2859_v54 = vpop.eup %2858  ;;  %v1786_v55 = vmul.f32 1.442695, %v1785_v53 }
 0xbfe   : > { %v1678_v56 = vsel %vm828_vm4, %v2859_v54, 0.0 }
 0xbff   : > { %2860 = vpow2.f32 %v1786_v55  ;;  %1679 = vadd.xlane.f32.xlu1 %v1678_v56 }
 0xc02   : > { %v1894_v60 = vpop.xlane.xlu1 %1893 }
 0xc03   : > { %v1895_v61 = vsub.f32 %v1887_v38, %v1894_v60 }
 0xc05   : > { %v1896_v62 = vmul.f32 1.442695, %v1895_v61 }
 0xc07   : > { %2862 = vpow2.f32 %v1896_v62 }
 0xc09   : > { %v2861_v58 = vpop.eup %2860 }
 0xc0a   : > { %v1788_v59 = vsel %vm828_vm4, %v2861_v58, 0.0 }
 0xc0b   : > { %1789 = vadd.xlane.f32.xlu0 %v1788_v59 }
 0xc10   : > { %1684 = vrot.lane.b32.xlu1 %v3702_v57, %s3185_s15 }
 0xc11   : > { %v2863_v63 = vpop.eup %2862 }
 0xc12   : > { %v1898_v1 = vsel %vm828_vm4, %v2863_v63, 0.0 }
 0xc1a   : > { %v1568_v2 = vpop.xlane.xlu0 %1567 }
 0xc1b   : > { %2864 = vrcp.f32 %v1568_v2  ;;  %v2826_v2 = vld [vmem:[#allocation15] sm:$0xff]  }
 0xc21   : > { %1573 = vrot.lane.b32.xlu0 %v3702_v57, %s3184_s29  ;;  %s3953_s29 = sld [smem:[#allocation36_spill]] }
 0xc25   : > { %1904 = vrot.lane.b32.xlu0 %v3702_v57, %s3188_s19  ;;  %v2865_v4 = vpop.eup %2864  ;;  %s3198_s19 = smov [#allocation16]  }
 0xc26   : > { %v1570_v6 = vmul.f32 %v2865_v4, %v2857_v47  ;;  %v2829_v4 = vld [vmem:[%s3891_s16 + $0x8] sm:$0xff]  }
 0xc27   : > { %s3954_s15 = smov %s3953_s29 }
 0xc28   : > { %v1571_v11 = vpack.c.bf16 %v1570_v6, %v1570_v6 }
 0xc34   : > { %1899 = vadd.xlane.f32.xlu1 %v1898_v1 }
 0xc45   : > { %1794 = vrot.lane.b32.xlu1 %v3702_v57, %s3186_s22 }
 0xc8c   : > { %v1680_v3 = vpop.xlane.xlu1 %1679 }
 0xc8d   : > { %2866 = vrcp.f32 %v1680_v3  ;;  %v2827_v3 = vld [vmem:[#allocation15 + $0x8] sm:$0xff]  }
 0xc90   : > { %v1685_v10 = vpop.permute.xlu1 %1684 }
 0xc91   : > { %v1690_v13 = vsel %vm892_vm6, %v1685_v10, 0 }
 0xc97   : > { %v2867_v12 = vpop.eup %2866 }
 0xc98   : > { %v1790_v5 = vpop.xlane.xlu0 %1789  ;;  %v1682_v57 = vmul.f32 %v2867_v12, %v2859_v54 }
 0xc99   : > { %2868 = vrcp.f32 %v1790_v5 }
 0xc9a   : > { %v1683_v14 = vpack.c.bf16 %v1682_v57, %v1682_v57  ;;  %v2054_v57 = vstv %s2414_s30 }
 0xc9c   : > { %v1574_v7 = vpop.permute.xlu0 %1573 }
 0xc9d   : > { %v1579_v9 = vsel %vm892_vm6, %v1574_v7, 0 }
 0xc9e   : > { %2608 = vmatpush3.bf16.msra.mxu1 %v1579_v9 }
 0xc9f   : > { %2619 = vmatprep.subr.bf16.mxu1 %v3181_v8 }
 0xca0   : > { %v1905_v20 = vpop.permute.xlu0 %1904 }
 0xca1   : > { %2610 = vmatmul.mubr.msk.bf16.vlgmr.msra.gmra.mrb[28].mxu1 %vm828_vm4, %v1571_v11  ;;  %v1910_v22 = vsel %vm892_vm6, %v1905_v20, 0  ;;  %v2830_v20 = vld [vmem:[%s3891_s16 + $0x10] sm:$0xff]  }
 0xca2   : > { %2620 = vmatpush3.bf16.msra.mxu1 %v1690_v13  ;;  %2621 = vmatprep.mubr.msk.bf16.mxu1 %vm3182_vm1, %v3181_v8 }
 0xca3   : > { %2631 = vmatprep.subr.bf16.mxu1 %v3181_v8  ;;  %v2869_v15 = vpop.eup %2868 }
 0xca4   : > { %v1792_v17 = vmul.f32 %v2869_v15, %v2861_v58 }
 0xca6   : > { %v1793_v21 = vpack.c.bf16 %v1792_v17, %v1792_v17 }
 0xca9   : > { %2622 = vmatmul.mubr.msk.bf16.vlgmr.msra.gmra.mrb[32].mxu1 %vm828_vm4, %v1683_v14 }
 0xcaa   : > { %2633 = vmatprep.mubr.msk.bf16.mxu1 %vm3182_vm1, %v3181_v8 }
 0xcc1   : > { %v1900_v16 = vpop.xlane.xlu1 %1899 }
 0xcc2   : > { %2870 = vrcp.f32 %v1900_v16  ;;  %v2057_v16 = vstv %s2415_s25 }
 0xcc5   : > { %v1795_v18 = vpop.permute.xlu1 %1794 }
 0xcc6   : > { %v1800_v19 = vsel %vm892_vm6, %v1795_v18, 0 }
 0xcc7   : > { %2632 = vmatpush3.bf16.msra.mxu1 %v1800_v19 }
 0xcc8   : > { %2643 = vmatprep.subr.bf16.mxu1 %v3181_v8 }
 0xcca   : > { %2634 = vmatmul.mubr.msk.bf16.vlgmr.msra.gmra.mrb[36].mxu1 %vm828_vm4, %v1793_v21  ;;  %v2831_v21 = vld [vmem:[%s3891_s16 + $0x18] sm:$0xff]  }
 0xccb   : > { %2644 = vmatpush3.bf16.msra.mxu1 %v1910_v22  ;;  %2645 = vmatprep.mubr.msk.bf16.mxu1 %vm3182_vm1, %v3181_v8 }
 0xccc   : > { %v2871_v24 = vpop.eup %2870  ;;  %2657 = vmatprep.subr.bf16.mxu1 %v3181_v8 }
 0xccd   : > { %v1902_v25 = vmul.f32 %v2871_v24, %v2863_v63 }
 0xccf   : > { %v1903_v26 = vpack.c.bf16 %v1902_v25, %v1902_v25 }
 0xcd2   : > { %2646 = vmatmul.mubr.msk.bf16.vlgmr.msra.gmra.mrb[40].mxu1 %vm828_vm4, %v1903_v26 }
 0xcd3   : > { %2661 = vmatprep.mubr.msk.bf16.mxu1 %vm3182_vm1, %v3181_v8  ;;  %2658 = vmatpush3.bf16.msra.mxu1 %v2826_v2 }
 0xcd4   : > { %2659 = vmatprep.subr.bf16.mxu1 %v3181_v8 }
 0xcd7   : > { %2660 = vmatpush3.bf16.msra.mxu1 %v2827_v3 }
 0xd74   : > { %v1615_v27 = vpop.f32.mrb[28].mxu1 }
 0xd75   : > { %v2611_v28 = vpop.f32.mrb[29].mxu1 }
 0xd76   : > { %v1618_v29 = vpop.f32.mrb[30].mxu1 }
 0xd77   : > { %v2612_v31 = vpop.f32.mrb[31].mxu1 }
 0xd7c   : > { %v1726_v0 = vpop.f32.mrb[32].mxu1 }
 0xd7d   : > { %1953 = vrot.lane.b32.xlu1 %v1726_v0, %s3946_s18  ;;  %v2623_v32 = vpop.f32.mrb[33].mxu1  ;;  %s3949_s18 = sld [smem:[#allocation24_spill]] }
 0xd7e   : > { %v1729_v44 = vpop.f32.mrb[34].mxu1 }
 0xd7f   : > { %v2624_v33 = vpop.f32.mrb[35].mxu1 }
 0xd9d   : > { %v1836_v36 = vpop.f32.mrb[36].mxu1 }
 0xd9e   : > { %1957 = vrot.lane.b32.xlu0 %v1836_v36, %s3947_s23  ;;  %v2635_v37 = vpop.f32.mrb[37].mxu1  ;;  %s3950_s23 = sld [smem:[#allocation34_spill]] }
 0xd9f   : > { %v1839_v30 = vpop.f32.mrb[38].mxu1 }
 0xda0   : > { %v2636_v38 = vpop.f32.mrb[39].mxu1 }
 0xda4   : > { %v2452_v22 = vld [vmem:[%s3950_s23] ss:$0 sm:$0xff]  ;;  %s3091_s23 = sshll.u32 %s3198_s19, 4  ;;  %s3092_s23 = int_to_ptr.vmem [resolvable:$false] %s3091_s23 }
 0xda5   : > { %v1946_v39 = vpop.f32.mrb[40].mxu1 }
 0xda6   : > { %1961 = vrot.lane.b32.xlu1 %v1946_v39, %s3948_s20  ;;  %v2647_v40 = vpop.f32.mrb[41].mxu1  ;;  %s696_s20 = sand.u32 1, %s3949_s18   ;;  %s3832_s18 = scalar_lea.hbm %s3953_s29, %s2463_s24 }
 0xda7   : > { %v1949_v41 = vpop.f32.mrb[42].mxu1  ;;  %s2408_s26 = sshll.u32 %s696_s20, 3  ;;  %s2214_s0 = scalar_lea.sflag [#allocation4], %s696_s20 }
 0xda8   : > { %v2648_v42 = vpop.f32.mrb[43].mxu1  ;;  %s698_s30 = scalar_lea.vmem [#allocation16], %s2408_s26  ;;  %s3093_s26 = scalar_lea.vmem %s3092_s23, 256 }
 0xda9   : > { %s2227_s25 = sshll.u32 %s698_s30, 4  ;;  %s3834_s25 = int_to_ptr.vmem [resolvable:$true] %s2227_s25 }
 0xdaa   : > { %s3087_s22 = scalar_lea.vmem %s3834_s25, 128  ;;  %p3094_p10 = scmp.lt.s32.totalorder %s3834_s25, %s3092_s23 }
 0xdab   : > { %p3088_p11 = scmp.ne.s32.totalorder %s3834_s25, %s3087_s22  ;;  %p3095_p1 = scmp.lt.s32.totalorder %s3093_s26, %s3087_s22 }
 0xdad   : > { %p3089_p5 = pnand %p3088_p11, %p3955_p13  ;;  %p3096_p6 = por %p3095_p1, %p3094_p10 }
 0xdaf   : > { %p3090_p0 = pneg %p3089_p5 }
 0xdb1   : > { %p3097_p9 = pnand %p3096_p6, %p3090_p0 }
 0xdef   : > { %v1954_v43 = vpop.permute.xlu1 %1953 }
 0xdf0   : > { %v1964_v46 = vsel %vm828_vm4, %v1615_v27, %v1954_v43 }
 0xe10   : > { %v1958_v45 = vpop.permute.xlu0 %1957 }
 0xe11   : > { %v1965_v47 = vsel %vm1279_vm7, %v1964_v46, %v1958_v45 }
 0xe18   : > { %v1962_v48 = vpop.permute.xlu1 %1961 }
 0xe19   : > { %v1966_v49 = vsel %vm1281_vm8, %v1965_v47, %v1962_v48 }
 0xe1a   : > { %v1967_v50 = vpack.c.bf16 %v1966_v49, %v1966_v49 }
 0xe1c   : > { %2654 = vmatmul.mubr.msk.bf16.vlgmr.msra.gmra.mrb[36].mxu0 %vm731_vm0, %v1967_v50 }
 0xe1d   : > { %2673 = vmatprep.mubr.msk.bf16.mxu0 %vm3182_vm1, %v3181_v8 }
 0xeef   : > { %v2028_v52 = vpop.f32.mrb[36].mxu0 }
 0xef0   : > { %v2029_v53 = vadd.f32 %v2448_v51, %v2028_v52  ;;  %v2655_v54 = vpop.f32.mrb[37].mxu0 }
 0xef1   : > { %v2031_v55 = vpop.f32.mrb[38].mxu0 }
 0xef2   : > { %v3797_v56 = vadd.f32 %v2029_v53, %v3675_v23  ;;  %v2656_v58 = vpop.f32.mrb[39].mxu0  ;;  %v2828_v23 = vld [vmem:[%s3891_s16] sm:$0xff]  }
 0xef3   : > { %2666 = vmatpush3.bf16.msra.mxu0 %v2828_v23 }
 0xef4   : > { %v2035_v59 = vsel %vm731_vm0, %v3797_v56, 0.0  ;;  %2667 = vmatprep.subr.bf16.mxu0 %v3181_v8 }
 0xef5   : > { %2036 = vadd.xlane.f32.xlu0 %v2035_v59 }
 0xef7   : > { %2668 = vmatpush3.bf16.msra.mxu0 %v2829_v4 }
 0xef8   : > { %2669 = vmatprep.subr.bf16.mxu0 %v3181_v8 }
 0xefb   : > { %2670 = vmatpush3.bf16.msra.mxu0 %v2830_v20 }
 0xefc   : > { %2671 = vmatprep.subr.bf16.mxu0 %v3181_v8  ;;  %v2456_v8 = vld [vmem:[%s3951_s28] ss:$0 sm:$0xff] }
 0xeff   : > { %2672 = vmatpush3.bf16.msra.mxu0 %v2831_v21 }
 0xf82   : > { %v2037_v60 = vpop.xlane.xlu0 %2036 }
 0xf83   : > { %v2038_v61 = vmul.f32 0.03125, %v2037_v60 }
 0xf85   : > { %v2039_v62 = vsub.f32 %v3797_v56, %v2038_v61 }
 0xf87   : > { %v2040_v63 = vmul.f32 %v2039_v62, %v2039_v62 }
 0xf89   : > { %v2041_v1 = vsel %vm731_vm0, %v2040_v63, 0.0 }
 0xf8a   : > { %2042 = vadd.xlane.f32.xlu1 %v2041_v1 }
0x1017   : > { %v2043_v5 = vpop.xlane.xlu1 %2042 }
0x1018   : > { %v2044_v6 = vmul.f32 0.032258064, %v2043_v5 }
0x101a   : > { %2872 = vrsqrt.f32 %v2044_v6  ;;  %vm2047_vm12 = vcmp.eq.f32.partialorder %v2044_v6, inf  ;;  %v2050_v10 = vand.u32 2147483648, %v2044_v6  ;;  %vm2049_vm13 = vcmp.eq.f32.partialorder %v2044_v6, 0.0 }
0x1024   : > { %v2873_v7 = vpop.eup %2872 }
0x1025   : > { %v2046_v9 = vmul.f32 %v2873_v7, %v2044_v6 }
0x1027   : > { %v2048_v11 = vsel %vm2047_vm12, %v2044_v6, %v2046_v9 }
0x1028   : > { %v2051_v12 = vsel %vm2049_vm13, %v2050_v10, %v2048_v11 }
0x1029   : > { %v2052_v13 = vadd.f32 1e-06, %v2051_v12 }
0x102b   : > { %2874 = vrcp.f32 %v2052_v13 }
0x1035   : > { %v2875_v14 = vpop.eup %2874 }
0x1036   : > { %v2055_v15 = vmul.f32 %v2875_v14, %v2054_v57 }
0x1038   : > { %v2056_v17 = vmul.f32 %v2055_v15, %v2039_v62 }
0x103a   : > { %v2058_v18 = vadd.f32 %v2057_v16, %v2056_v17 }
0x103c   : > { %v2059_v19 = vpack.c.bf16 %v2058_v18, %v2058_v18 }
0x103e   : > { %2662 = vmatmul.mubr.msk.bf16.vlgmr.msra.gmra.mrb[44].mxu1 %vm731_vm0, %v2059_v19 }
0x1111   : > { %v2120_v24 = vpop.f32.mrb[44].mxu1 }
0x1112   : > { %v2121_v25 = vadd.f32 %v2452_v22, %v2120_v24  ;;  %v2663_v26 = vpop.f32.mrb[45].mxu1 }
0x1113   : > { %v2123_v27 = vpop.f32.mrb[46].mxu1 }
0x1114   : > { %v2126_v28 = vmax.f32 %v2121_v25, 0.0  ;;  %v2664_v29 = vpop.f32.mrb[47].mxu1 }
0x1116   : > { %v2127_v31 = vpack.c.bf16 %v2126_v28, %v2126_v28 }
0x1118   : > { %2674 = vmatmul.mubr.msk.bf16.vlgmr.msra.gmra.mrb[40].mxu0 %vm2167_vm14, %v2127_v31 }
0x11eb   : > { %v2205_v0 = vpop.f32.mrb[40].mxu0 }
0x11ec   : > { %v2206_v32 = vadd.f32 %v2456_v8, %v2205_v0  ;;  %v2675_v44 = vpop.f32.mrb[41].mxu0 }
0x11ed   : > { %v2208_v33 = vpop.f32.mrb[42].mxu0 }
0x11ee   : > { %v2211_v34 = vadd.f32 %v2206_v32, %v3797_v56  ;;  %v2676_v35 = vpop.f32.mrb[43].mxu0 }
0x11f0   : > { %2212 = vst.msk [vmem:[%s698_s30] sm:$0xff] %vm731_vm0, %v2211_v34 }
0x11f1   : > { %3100 = shalt.err (!%p3097_p9)
}
0x11f2   : > { %s3101_s20 = scalar_lea.hbm %s3832_s18, 128  ;;  %s3105_s28 = scalar_lea.hbm %s3954_s15, 256 }
0x11f3   : > { %p3102_p12 = scmp.ne.s32.totalorder %s3832_s18, %s3101_s20  ;;  %p3106_p4 = scmp.lt.u32.totalorder %s3832_s18, %s3954_s15 }
0x11f4   : > { %p3107_p7 = scmp.lt.u32.totalorder %s3105_s28, %s3101_s20  ;;  %p3109_p11 = scmp.lt.u32.totalorder %s3101_s20, %s3832_s18 }
0x11f5   : > { %p3103_p2 = pnand %p3102_p12, %p3955_p13 }
0x11f6   : > { %p3108_p8 = por %p3107_p7, %p3106_p4 }
0x11f7   : > { %p3104_p3 = pneg %p3103_p2 }
0x11f8   : > { %p3110_p5 = por %p3109_p11, %p3108_p8 }
0x11fa   : > { %p3111_p0 = pnand %p3110_p5, %p3104_p3 }
0x11fc   : > { %3114 = shalt.err (!%p3111_p0)
}
0x11fd   : > { %2709 = dma.vmem_to_hbm [thread:$0]  (%p3955_p13), %s3834_s25, 128, %s3832_s18, %s2214_s0  }
0x11fe PF: > { %s3956_s17 = sld [smem:[#allocation26_spill]]  ;;  %s3957_s1 = sld [smem:[#allocation23_spill]] }
0x11ff   : > { %s3958_s29 = sld [smem:[#allocation30_spill]] }
0x1204   : > { %p2756_p10 = scmp.ge.s32.totalorder %s3956_s17, 2  ;;  %s2239_s22 = sand.u32 1, %s3957_s1  }
0x1205   : > { %p3959_p1 = scmp.ne.s32.totalorder %s3958_s29, 0  ;;  %s2240_s19 = scalar_lea.sflag [#allocation4], %s2239_s22 }
0x1207   : > { %p2737_p6 = pnand %p2756_p10, %p3959_p1 }
0x1209   : > { %3152 = dma.done.wait (!%p2737_p6), %s2240_s19, 128  }
0x120a   : > { %3154 = vsyncadd (!%p2737_p6), %s2240_s19, 4294967168  ;;  %s3960_s30 = sld [smem:[#allocation27_spill]]  ;;  %s3961_s27 = sld [smem:[#allocation24_spill]] }
0x120b   : > { %s3962_s28 = sld [smem:[#allocation25_spill]]  ;;  %s3963_s29 = sld [smem:[#allocation28_spill]] }
0x1210   : > { %p33_p9 = scmp.ge.s32.totalorder %s3960_s30, 4  }
0x1212   :  { %35 = sbr.rel (!%p33_p9) target bundleno = 15 (0xf), region = 167 }
0x1219   :  { %2245 = vsyncpa [#allocation3], 1 }
0x121a   :  { %2247 = vsyncpa [#allocation3 + $0x1], 1 }
0x121b   :  { %2248 = vsyncpa [#allocation8], 1 }
0x121c   :  { %2249 = vsyncpa [#allocation11], 1 }
0x121d   :  { %2250 = vsyncpa [#allocation14], 1 }
0x121e   :  { %2251 = vsyncpa [#allocation4], 1 }
0x121f   :  { %2253 = vsyncpa [#allocation4 + $0x1], 1 }
0x1220   :  { %2254 = vsyncpa [#allocation5], 1 }
0x1221   :  { %2256 = vsyncpa [#allocation5 + $0x1], 1 }

</bundles_post_ra>
